<compile_context>
chip_gen: v7x
topology: tpu7x:2x2x1
jax: 0.10.0
libtpu: 0.0.40
codegen_flags: <defaults>
</compile_context>

<pallas_src>
import functools

import jax
import jax.numpy as jnp
from jax import lax
from jax.experimental import pallas as pl
from jax.experimental.pallas import tpu as pltpu

LANE = 128


def _round_up(x, m):
    return (x + m - 1) // m * m


def _pad_axis(a, target, axis):
    pad = target - a.shape[axis]
    if pad == 0:
        return a
    widths = [(0, 0)] * a.ndim
    widths[axis] = (0, pad)
    return jnp.pad(a, widths)


# ---------------------------------------------------------------------------
# Pallas kernel: one grid step == B_blk batch elements, everything fused.
#
# Flat zero-halo layout: element b of the block owns rows [b*tp, (b+1)*tp) of each
# scratch; its data sits at sublane offset P (plus dh//2 for the F.pad of the
# up-sampled stream) and the remaining rows are zero.  A (K,1) conv with 'same'
# padding is then K shifted (M, C) @ (C, C) matmuls on the flat scratch, with
# M = B_blk * tp; the valid rows of the result are [b*tp, b*tp + T2) per element.
# ---------------------------------------------------------------------------
def upblock_kernel(x1_ref, x2_ref, wup_ref, w1a_ref, w1b_ref, w2_ref, bias_ref,
                   out_ref, sa_ref, sb_ref, *, tp, dh):
    f32 = jnp.float32
    B, T1, Cin = x1_ref.shape
    _, T2, C = x2_ref.shape
    K = w1a_ref.shape[0]
    P = K // 2
    M = B * tp                                   # flat matmul M dimension

    # (0) Re-zero the halo scratches (they persist across grid steps).
    sa_ref[...] = jnp.zeros_like(sa_ref)
    sb_ref[...] = jnp.zeros_like(sb_ref)

    # (1) ConvTranspose2d((1,3), stride=(1,2), pad=(0,1)) with W == 1: only the
    #     centre W-tap reaches the output -> one big (B*T1, Cin) @ (Cin, C) matmul.
    x1 = x1_ref[...].reshape(B * T1, Cin)
    y = jnp.dot(x1, wup_ref[...], preferred_element_type=f32) + bias_ref[0:1, :]

    # (2)+(3) Scatter both conv-1 input streams into the zero-halo scratches:
    #     stream A = up-sampled + F.pad'ed y, stream B = skip connection x2.
    off_a = P + dh // 2                          # conv halo + F.pad top offset
    x2 = x2_ref[...]
    for b in range(B):                           # static unroll: stores only
        sa_ref[pl.ds(b * tp + off_a, T1), :] = (
            y[b * T1:(b + 1) * T1, :].astype(sa_ref.dtype))
        sb_ref[pl.ds(b * tp + P, T2), :] = x2[b].astype(sb_ref.dtype)

    # (4) Conv2d((K,1), 'same') as K shifted flat matmuls.  The channel concat of
    #     [y_pad, x2] is eliminated by splitting w1 into w1a (y rows) and w1b
    #     (x2 rows) and accumulating two dots.  BN1 is pre-folded into w1/b1.
    def conv_k(s_ref, w_ref, acc):
        for r in range(K):                       # K static taps
            acc = acc + jnp.dot(s_ref[pl.ds(r, M), :], w_ref[r],
                                preferred_element_type=f32)
        return acc

    z = conv_k(sb_ref, w1b_ref, conv_k(sa_ref, w1a_ref, jnp.zeros((M, C), f32)))
    z = jnp.maximum(z + bias_ref[1:2, :], 0.0)           # conv1 + BN1 + ReLU

    # (5) Second conv: reuse the stream-A scratch as the halo buffer for z
    #     (the new [P, P+T2) rows fully cover the old y rows; halos stay zero).
    for b in range(B):
        sa_ref[pl.ds(b * tp + P, T2), :] = (
            z[b * tp:b * tp + T2, :].astype(sa_ref.dtype))
    z2 = conv_k(sa_ref, w2_ref, jnp.zeros((M, C), f32))
    z2 = jnp.maximum(z2 + bias_ref[2:3, :], 0.0)         # conv2 + BN2 + ReLU

    # valid rows only, lane-dense store (C is a multiple of 128).
    out_ref[...] = z2.reshape(B, tp, C)[:, :T2, :].astype(out_ref.dtype)


# ---------------------------------------------------------------------------
# Wrapper: NCHW <-> (N, T, C) layout plumbing, BN folding, channel padding,
#          batch-block selection, pallas_call.
# ---------------------------------------------------------------------------
def upblock_pallas(x1, x2, p, kernel_size=3, compute_dtype=jnp.float32,
                   target_rows=256):
    N, Cin, T1, W1 = x1.shape
    N2, Cout, T2, W2 = x2.shape
    assert N == N2 and Cin == 2 * Cout, f"x1={x1.shape}, x2={x2.shape}"
    assert abs(T1 - T2 // 2) < 3, f"x1={x1.shape}, x2={x2.shape}"
    assert T2 >= T1, "negative F.pad (T1 > T2) is not supported"
    # TODO(synk): general W>1 transposed-conv upsampling path; the openpack IMU UNet
    #             always runs this block with W == 1 (the stride-2 acts on W, exactly
    #             as the PyTorch module is written).
    assert W1 == 1 and W2 == 1, "kernel implements the W==1 case used by the model"

    K = kernel_size
    P = K // 2
    assert K % 2 == 1 and 2 * P <= 8, "odd kernel_size <= 9 supported"
    eps = 1e-5
    f32 = jnp.float32
    dh = T2 - T1

    # lane-dense channel padding (multiples of 128 lanes -> unmasked vst, wide MXU N)
    cin_p = _round_up(Cin, LANE)
    c_p = _round_up(Cout, LANE)

    # activations: NCHW -> (N, T, C), zero-pad channels, cast to compute dtype
    x1_l = _pad_axis(jnp.transpose(x1[..., 0], (0, 2, 1)).astype(f32), cin_p, 2)
    x2_l = _pad_axis(jnp.transpose(x2[..., 0], (0, 2, 1)).astype(f32), c_p, 2)
    x1_l = x1_l.astype(compute_dtype)
    x2_l = x2_l.astype(compute_dtype)

    # fold inference BatchNorm into the conv weights / biases (host side, free)
    sc1 = p["bn1_g"] / jnp.sqrt(p["bn1_v"] + eps)
    sh1 = p["bn1_b"] - p["bn1_m"] * sc1
    sc2 = p["bn2_g"] / jnp.sqrt(p["bn2_v"] + eps)
    sh2 = p["bn2_b"] - p["bn2_m"] * sc2

    w_up = p["up_w"][:, :, 0, 1].astype(f32)                            # (Cin, Cout) centre tap
    w1_t = jnp.transpose(p["c1_w"][:, :, :, 0], (2, 1, 0)).astype(f32)  # (K, 2*Cout, Cout)
    w1a = w1_t[:, :Cout, :] * sc1[None, None, :]                        # rows for y_pad stream
    w1b = w1_t[:, Cout:, :] * sc1[None, None, :]                        # rows for x2 stream
    w2 = jnp.transpose(p["c2_w"][:, :, :, 0], (2, 1, 0)).astype(f32) * sc2[None, None, :]

    b_up = p["up_b"].astype(f32)
    b1 = p["c1_b"].astype(f32) * sc1 + sh1
    b2 = p["c2_b"].astype(f32) * sc2 + sh2
    bias = jnp.stack([_pad_axis(b_up, c_p, 0),
                      _pad_axis(b1, c_p, 0),
                      _pad_axis(b2, c_p, 0)], axis=0)                   # (3, c_p), f32

    w_up_p = _pad_axis(_pad_axis(w_up, cin_p, 0), c_p, 1).astype(compute_dtype)
    w1a_p = _pad_axis(_pad_axis(w1a, c_p, 1), c_p, 2).astype(compute_dtype)
    w1b_p = _pad_axis(_pad_axis(w1b, c_p, 1), c_p, 2).astype(compute_dtype)
    w2_p = _pad_axis(_pad_axis(w2, c_p, 1), c_p, 2).astype(compute_dtype)

    # pack B_blk batch elements per grid step so the matmul M dim is ~target_rows
    b_blk = 1
    for cand in range(1, N + 1):
        if N % cand == 0 and cand * T2 <= target_rows:
            b_blk = cand
    tp = _round_up(T2 + 2 * P, 8)       # per-element stride in the flat scratch
    ltot = b_blk * tp + 8               # extra zero rows for the last K-1 tap reads

    # Working set per step is well under the default scoped-VMEM limit on
    # v5e/v6e/v7x for these shapes; if tiles are grown (larger target_rows / C),
    # set pltpu.CompilerParams(vmem_limit_bytes=...) accordingly.
    kernel = functools.partial(upblock_kernel, tp=tp, dh=dh)
    out = pl.pallas_call(
        kernel,
        out_shape=jax.ShapeDtypeStruct((N, T2, c_p), compute_dtype),
        grid=(N // b_blk,),
        in_specs=[
            pl.BlockSpec((b_blk, T1, cin_p), lambda n: (n, 0, 0)),   # x1 (main)
            pl.BlockSpec((b_blk, T2, c_p), lambda n: (n, 0, 0)),     # x2 (skip)
            pl.BlockSpec((cin_p, c_p), lambda n: (0, 0)),            # w_up centre tap
            pl.BlockSpec((K, c_p, c_p), lambda n: (0, 0, 0)),        # w1a (BN folded)
            pl.BlockSpec((K, c_p, c_p), lambda n: (0, 0, 0)),        # w1b (BN folded)
            pl.BlockSpec((K, c_p, c_p), lambda n: (0, 0, 0)),        # w2  (BN folded)
            pl.BlockSpec((3, c_p), lambda n: (0, 0)),                # merged biases
        ],
        out_specs=pl.BlockSpec((b_blk, T2, c_p), lambda n: (n, 0, 0)),
        scratch_shapes=[pltpu.VMEM((ltot, c_p), compute_dtype),      # stream A / z1 halo buf
                        pltpu.VMEM((ltot, c_p), compute_dtype)],     # stream B (skip) halo buf
        compiler_params=pltpu.CompilerParams(
            dimension_semantics=("parallel",)),
    )(x1_l, x2_l, w_up_p, w1a_p, w1b_p, w2_p, bias)

    # back to NCHW = (N, Cout, T2, 1); drop the lane padding
    return jnp.transpose(out[:, :, :Cout], (0, 2, 1))[..., None]


# ---------------------------------------------------------------------------
# Pure-JAX reference (mirrors the PyTorch forward exactly, NCHW).
# ---------------------------------------------------------------------------
def upblock_reference(x1, x2, p, kernel_size=3):
    K = kernel_size
    eps = 1e-5
    dn = ("NCHW", "OIHW", "NCHW")

    # ConvTranspose2d == cross-correlation with flipped kernel on lhs-dilated input.
    wt = jnp.transpose(jnp.flip(p["up_w"], axis=(2, 3)), (1, 0, 2, 3))  # (Cout, Cin, 1, 3)
    y = lax.conv_general_dilated(x1, wt, window_strides=(1, 1),
                                 padding=[(0, 0), (1, 1)],
                                 lhs_dilation=(1, 2),
                                 dimension_numbers=dn)
    y = y + p["up_b"][None, :, None, None]

    dh = x2.shape[2] - y.shape[2]
    dw = x2.shape[3] - y.shape[3]
    y = jnp.pad(y, ((0, 0), (0, 0), (dh // 2, dh - dh // 2), (dw // 2, dw - dw // 2)))
    x = jnp.concatenate([y, x2], axis=1)

    def conv_bn_relu(x, w, b, g, beta, mean, var):
        z = lax.conv_general_dilated(x, w, (1, 1), [(K // 2, K // 2), (0, 0)],
                                     dimension_numbers=dn)
        z = z + b[None, :, None, None]
        scale = g / jnp.sqrt(var + eps)
        z = (z - mean[None, :, None, None]) * scale[None, :, None, None] \
            + beta[None, :, None, None]
        return jnp.maximum(z, 0.0)

    x = conv_bn_relu(x, p["c1_w"], p["c1_b"], p["bn1_g"], p["bn1_b"], p["bn1_m"], p["bn1_v"])
    x = conv_bn_relu(x, p["c2_w"], p["c2_b"], p["bn2_g"], p["bn2_b"], p["bn2_m"], p["bn2_v"])
    return x


if __name__ == "__main__":
    key = jax.random.PRNGKey(0)
    N, in_ch, out_ch, K = 8, 8, 4, 3
    T1, T2, W = 8, 16, 1

    ks = jax.random.split(key, 16)
    f32 = jnp.float32
    x1 = jax.random.normal(ks[0], (N, in_ch, T1, W), f32)          # main stream (N, C, T, 1)
    x2 = jax.random.normal(ks[1], (N, out_ch, T2, W), f32)         # skip conn  (N, C//2, 2T, 1)

    params = dict(
        up_w=jax.random.normal(ks[2], (in_ch, out_ch, 1, 3), f32) * 0.1,   # ConvTranspose2d weight
        up_b=jax.random.normal(ks[3], (out_ch,), f32) * 0.1,
        c1_w=jax.random.normal(ks[4], (out_ch, 2 * out_ch, K, 1), f32) * 0.1,
        c1_b=jax.random.normal(ks[5], (out_ch,), f32) * 0.1,
        bn1_g=jax.random.uniform(ks[6], (out_ch,), f32, 0.5, 1.5),
        bn1_b=jax.random.normal(ks[7], (out_ch,), f32) * 0.1,
        bn1_m=jax.random.normal(ks[8], (out_ch,), f32) * 0.1,
        bn1_v=jax.random.uniform(ks[9], (out_ch,), f32, 0.5, 1.5),
        c2_w=jax.random.normal(ks[10], (out_ch, out_ch, K, 1), f32) * 0.1,
        c2_b=jax.random.normal(ks[11], (out_ch,), f32) * 0.1,
        bn2_g=jax.random.uniform(ks[12], (out_ch,), f32, 0.5, 1.5),
        bn2_b=jax.random.normal(ks[13], (out_ch,), f32) * 0.1,
        bn2_m=jax.random.normal(ks[14], (out_ch,), f32) * 0.1,
        bn2_v=jax.random.uniform(ks[15], (out_ch,), f32, 0.5, 1.5),
    )

    ref = upblock_reference(x1, x2, params, kernel_size=K)

    # f32 path (exact check).
    run = jax.jit(functools.partial(upblock_pallas, kernel_size=K))
    out = jax.block_until_ready(run(x1, x2, params))
    assert out.shape == ref.shape == (N, out_ch, T2, W), (out.shape, ref.shape)
    max_err = float(jnp.max(jnp.abs(out - ref)))
    if not bool(jnp.allclose(out, ref, atol=1e-4, rtol=1e-4)):
        raise AssertionError(f"Pallas(f32) vs reference mismatch, max abs err = {max_err}")

    # bf16 compute path (v6e/v7x feedback): bf16 acts/weights, f32 accumulation.
    run_bf16 = jax.jit(functools.partial(upblock_pallas, kernel_size=K,
                                         compute_dtype=jnp.bfloat16))
    out_bf16 = jax.block_until_ready(run_bf16(x1, x2, params)).astype(f32)
    max_err_bf16 = float(jnp.max(jnp.abs(out_bf16 - ref)))
    if not bool(jnp.allclose(out_bf16, ref, atol=1e-1, rtol=1e-1)):
        raise AssertionError(f"Pallas(bf16) vs reference mismatch, max abs err = {max_err_bf16}")

    print("KERNEL_OK")
</pallas_src>

<mosaic_0001>
module attributes {stable_mosaic.version = 11 : i64} {
  func.func @upblock_kernel(%arg0: i32, %arg1: memref<8x8x128xf32, #tpu.memory_space<vmem>>, %arg2: memref<8x16x128xf32, #tpu.memory_space<vmem>>, %arg3: memref<128x128xf32, #tpu.memory_space<vmem>>, %arg4: memref<3x128x128xf32, #tpu.memory_space<vmem>>, %arg5: memref<3x128x128xf32, #tpu.memory_space<vmem>>, %arg6: memref<3x128x128xf32, #tpu.memory_space<vmem>>, %arg7: memref<3x128xf32, #tpu.memory_space<vmem>>, %arg8: memref<8x16x128xf32, #tpu.memory_space<vmem>>, %arg9: memref<200x128xf32, #tpu.memory_space<vmem>>, %arg10: memref<200x128xf32, #tpu.memory_space<vmem>>) attributes {dimension_semantics = [#tpu.dimension_semantics<parallel>], iteration_bounds = array<i64: 1>, scalar_prefetch = 0 : i64, scratch_operands = 2 : i64, tpu.core_type = #tpu.core_type<tc>, window_params = [{transform_indices = @transform_0, window_bounds = array<i64: 8, 8, 128>}, {transform_indices = @transform_1, window_bounds = array<i64: 8, 16, 128>}, {pipeline_mode = #tpu.pipeline_mode<synchronous>, transform_indices = @transform_2, window_bounds = array<i64: 128, 128>}, {pipeline_mode = #tpu.pipeline_mode<synchronous>, transform_indices = @transform_3, window_bounds = array<i64: 3, 128, 128>}, {pipeline_mode = #tpu.pipeline_mode<synchronous>, transform_indices = @transform_4, window_bounds = array<i64: 3, 128, 128>}, {pipeline_mode = #tpu.pipeline_mode<synchronous>, transform_indices = @transform_5, window_bounds = array<i64: 3, 128, 128>}, {pipeline_mode = #tpu.pipeline_mode<synchronous>, transform_indices = @transform_6, window_bounds = array<i64: 3, 128>}, {transform_indices = @transform_7, window_bounds = array<i64: 8, 16, 128>}]} {
    %cst = arith.constant 0.000000e+00 : f32
    %0 = vector.broadcast %cst : f32 to vector<200x128xf32>
    %c0 = arith.constant 0 : index
    %c0_0 = arith.constant 0 : index
    %1 = vector.load %arg9[%c0, %c0_0] : memref<200x128xf32, #tpu.memory_space<vmem>>, vector<200x128xf32>
    tpu.vector_store %arg9[%c0, %c0_0], %0 {strides = array<i32>} : memref<200x128xf32, #tpu.memory_space<vmem>>, vector<200x128xf32>,
    %cst_1 = arith.constant 0.000000e+00 : f32
    %2 = vector.broadcast %cst_1 : f32 to vector<200x128xf32>
    %c0_2 = arith.constant 0 : index
    %c0_3 = arith.constant 0 : index
    %3 = vector.load %arg10[%c0_2, %c0_3] : memref<200x128xf32, #tpu.memory_space<vmem>>, vector<200x128xf32>
    tpu.vector_store %arg10[%c0_2, %c0_3], %2 {strides = array<i32>} : memref<200x128xf32, #tpu.memory_space<vmem>>, vector<200x128xf32>,
    %c0_4 = arith.constant 0 : index
    %c0_5 = arith.constant 0 : index
    %c0_6 = arith.constant 0 : index
    %4 = vector.load %arg1[%c0_4, %c0_5, %c0_6] : memref<8x8x128xf32, #tpu.memory_space<vmem>>, vector<8x8x128xf32>
    %5 = vector.shape_cast %4 : vector<8x8x128xf32> to vector<64x128xf32>
    %c0_7 = arith.constant 0 : index
    %c0_8 = arith.constant 0 : index
    %6 = vector.load %arg3[%c0_7, %c0_8] : memref<128x128xf32, #tpu.memory_space<vmem>>, vector<128x128xf32>
    %cst_9 = arith.constant dense<0.000000e+00> : vector<64x128xf32>
    %7 = tpu.matmul %5, %6, %cst_9 {dimension_numbers = #tpu.dot_dimension_numbers<[1], [0], [0], [1], [0, 0, 1, 1], [], []>} : vector<64x128xf32>, vector<128x128xf32>, vector<64x128xf32> -> vector<64x128xf32>
    %c0_10 = arith.constant 0 : index
    %c0_11 = arith.constant 0 : index
    %8 = vector.load %arg7[%c0_10, %c0_11] : memref<3x128xf32, #tpu.memory_space<vmem>>, vector<1x128xf32>
    %9 = vector.broadcast %8 : vector<1x128xf32> to vector<64x128xf32>
    %10 = arith.addf %7, %9 : vector<64x128xf32>
    %c0_12 = arith.constant 0 : index
    %c0_13 = arith.constant 0 : index
    %c0_14 = arith.constant 0 : index
    %11 = vector.load %arg2[%c0_12, %c0_13, %c0_14] : memref<8x16x128xf32, #tpu.memory_space<vmem>>, vector<8x16x128xf32>
    %12 = vector.extract_strided_slice %10 {offsets = [0, 0], sizes = [8, 128], strides = [1, 1]} : vector<64x128xf32> to vector<8x128xf32>
    %c5 = arith.constant 5 : index
    %c0_15 = arith.constant 0 : index
    %13 = vector.load %arg9[%c5, %c0_15] : memref<200x128xf32, #tpu.memory_space<vmem>>, vector<8x128xf32>
    tpu.vector_store %arg9[%c5, %c0_15], %12 {strides = array<i32>} : memref<200x128xf32, #tpu.memory_space<vmem>>, vector<8x128xf32>,
    %14 = vector.extract_strided_slice %11 {offsets = [0, 0, 0], sizes = [1, 16, 128], strides = [1, 1, 1]} : vector<8x16x128xf32> to vector<1x16x128xf32>
    %15 = vector.shape_cast %14 : vector<1x16x128xf32> to vector<16x128xf32>
    %c1 = arith.constant 1 : index
    %c0_16 = arith.constant 0 : index
    %16 = vector.load %arg10[%c1, %c0_16] : memref<200x128xf32, #tpu.memory_space<vmem>>, vector<16x128xf32>
    tpu.vector_store %arg10[%c1, %c0_16], %15 {strides = array<i32>} : memref<200x128xf32, #tpu.memory_space<vmem>>, vector<16x128xf32>,
    %17 = vector.extract_strided_slice %10 {offsets = [8, 0], sizes = [8, 128], strides = [1, 1]} : vector<64x128xf32> to vector<8x128xf32>
    %c29 = arith.constant 29 : index
    %c0_17 = arith.constant 0 : index
    %18 = vector.load %arg9[%c29, %c0_17] : memref<200x128xf32, #tpu.memory_space<vmem>>, vector<8x128xf32>
    tpu.vector_store %arg9[%c29, %c0_17], %17 {strides = array<i32>} : memref<200x128xf32, #tpu.memory_space<vmem>>, vector<8x128xf32>,
    %19 = vector.extract_strided_slice %11 {offsets = [1, 0, 0], sizes = [1, 16, 128], strides = [1, 1, 1]} : vector<8x16x128xf32> to vector<1x16x128xf32>
    %20 = vector.shape_cast %19 : vector<1x16x128xf32> to vector<16x128xf32>
    %c25 = arith.constant 25 : index
    %c0_18 = arith.constant 0 : index
    %21 = vector.load %arg10[%c25, %c0_18] : memref<200x128xf32, #tpu.memory_space<vmem>>, vector<16x128xf32>
    tpu.vector_store %arg10[%c25, %c0_18], %20 {strides = array<i32>} : memref<200x128xf32, #tpu.memory_space<vmem>>, vector<16x128xf32>,
    %22 = vector.extract_strided_slice %10 {offsets = [16, 0], sizes = [8, 128], strides = [1, 1]} : vector<64x128xf32> to vector<8x128xf32>
    %c53 = arith.constant 53 : index
    %c0_19 = arith.constant 0 : index
    %23 = vector.load %arg9[%c53, %c0_19] : memref<200x128xf32, #tpu.memory_space<vmem>>, vector<8x128xf32>
    tpu.vector_store %arg9[%c53, %c0_19], %22 {strides = array<i32>} : memref<200x128xf32, #tpu.memory_space<vmem>>, vector<8x128xf32>,
    %24 = vector.extract_strided_slice %11 {offsets = [2, 0, 0], sizes = [1, 16, 128], strides = [1, 1, 1]} : vector<8x16x128xf32> to vector<1x16x128xf32>
    %25 = vector.shape_cast %24 : vector<1x16x128xf32> to vector<16x128xf32>
    %c49 = arith.constant 49 : index
    %c0_20 = arith.constant 0 : index
    %26 = vector.load %arg10[%c49, %c0_20] : memref<200x128xf32, #tpu.memory_space<vmem>>, vector<16x128xf32>
    tpu.vector_store %arg10[%c49, %c0_20], %25 {strides = array<i32>} : memref<200x128xf32, #tpu.memory_space<vmem>>, vector<16x128xf32>,
    %27 = vector.extract_strided_slice %10 {offsets = [24, 0], sizes = [8, 128], strides = [1, 1]} : vector<64x128xf32> to vector<8x128xf32>
    %c77 = arith.constant 77 : index
    %c0_21 = arith.constant 0 : index
    %28 = vector.load %arg9[%c77, %c0_21] : memref<200x128xf32, #tpu.memory_space<vmem>>, vector<8x128xf32>
    tpu.vector_store %arg9[%c77, %c0_21], %27 {strides = array<i32>} : memref<200x128xf32, #tpu.memory_space<vmem>>, vector<8x128xf32>,
    %29 = vector.extract_strided_slice %11 {offsets = [3, 0, 0], sizes = [1, 16, 128], strides = [1, 1, 1]} : vector<8x16x128xf32> to vector<1x16x128xf32>
    %30 = vector.shape_cast %29 : vector<1x16x128xf32> to vector<16x128xf32>
    %c73 = arith.constant 73 : index
    %c0_22 = arith.constant 0 : index
    %31 = vector.load %arg10[%c73, %c0_22] : memref<200x128xf32, #tpu.memory_space<vmem>>, vector<16x128xf32>
    tpu.vector_store %arg10[%c73, %c0_22], %30 {strides = array<i32>} : memref<200x128xf32, #tpu.memory_space<vmem>>, vector<16x128xf32>,
    %32 = vector.extract_strided_slice %10 {offsets = [32, 0], sizes = [8, 128], strides = [1, 1]} : vector<64x128xf32> to vector<8x128xf32>
    %c101 = arith.constant 101 : index
    %c0_23 = arith.constant 0 : index
    %33 = vector.load %arg9[%c101, %c0_23] : memref<200x128xf32, #tpu.memory_space<vmem>>, vector<8x128xf32>
    tpu.vector_store %arg9[%c101, %c0_23], %32 {strides = array<i32>} : memref<200x128xf32, #tpu.memory_space<vmem>>, vector<8x128xf32>,
    %34 = vector.extract_strided_slice %11 {offsets = [4, 0, 0], sizes = [1, 16, 128], strides = [1, 1, 1]} : vector<8x16x128xf32> to vector<1x16x128xf32>
    %35 = vector.shape_cast %34 : vector<1x16x128xf32> to vector<16x128xf32>
    %c97 = arith.constant 97 : index
    %c0_24 = arith.constant 0 : index
    %36 = vector.load %arg10[%c97, %c0_24] : memref<200x128xf32, #tpu.memory_space<vmem>>, vector<16x128xf32>
    tpu.vector_store %arg10[%c97, %c0_24], %35 {strides = array<i32>} : memref<200x128xf32, #tpu.memory_space<vmem>>, vector<16x128xf32>,
    %37 = vector.extract_strided_slice %10 {offsets = [40, 0], sizes = [8, 128], strides = [1, 1]} : vector<64x128xf32> to vector<8x128xf32>
    %c125 = arith.constant 125 : index
    %c0_25 = arith.constant 0 : index
    %38 = vector.load %arg9[%c125, %c0_25] : memref<200x128xf32, #tpu.memory_space<vmem>>, vector<8x128xf32>
    tpu.vector_store %arg9[%c125, %c0_25], %37 {strides = array<i32>} : memref<200x128xf32, #tpu.memory_space<vmem>>, vector<8x128xf32>,
    %39 = vector.extract_strided_slice %11 {offsets = [5, 0, 0], sizes = [1, 16, 128], strides = [1, 1, 1]} : vector<8x16x128xf32> to vector<1x16x128xf32>
    %40 = vector.shape_cast %39 : vector<1x16x128xf32> to vector<16x128xf32>
    %c121 = arith.constant 121 : index
    %c0_26 = arith.constant 0 : index
    %41 = vector.load %arg10[%c121, %c0_26] : memref<200x128xf32, #tpu.memory_space<vmem>>, vector<16x128xf32>
    tpu.vector_store %arg10[%c121, %c0_26], %40 {strides = array<i32>} : memref<200x128xf32, #tpu.memory_space<vmem>>, vector<16x128xf32>,
    %42 = vector.extract_strided_slice %10 {offsets = [48, 0], sizes = [8, 128], strides = [1, 1]} : vector<64x128xf32> to vector<8x128xf32>
    %c149 = arith.constant 149 : index
    %c0_27 = arith.constant 0 : index
    %43 = vector.load %arg9[%c149, %c0_27] : memref<200x128xf32, #tpu.memory_space<vmem>>, vector<8x128xf32>
    tpu.vector_store %arg9[%c149, %c0_27], %42 {strides = array<i32>} : memref<200x128xf32, #tpu.memory_space<vmem>>, vector<8x128xf32>,
    %44 = vector.extract_strided_slice %11 {offsets = [6, 0, 0], sizes = [1, 16, 128], strides = [1, 1, 1]} : vector<8x16x128xf32> to vector<1x16x128xf32>
    %45 = vector.shape_cast %44 : vector<1x16x128xf32> to vector<16x128xf32>
    %c145 = arith.constant 145 : index
    %c0_28 = arith.constant 0 : index
    %46 = vector.load %arg10[%c145, %c0_28] : memref<200x128xf32, #tpu.memory_space<vmem>>, vector<16x128xf32>
    tpu.vector_store %arg10[%c145, %c0_28], %45 {strides = array<i32>} : memref<200x128xf32, #tpu.memory_space<vmem>>, vector<16x128xf32>,
    %47 = vector.extract_strided_slice %10 {offsets = [56, 0], sizes = [8, 128], strides = [1, 1]} : vector<64x128xf32> to vector<8x128xf32>
    %c173 = arith.constant 173 : index
    %c0_29 = arith.constant 0 : index
    %48 = vector.load %arg9[%c173, %c0_29] : memref<200x128xf32, #tpu.memory_space<vmem>>, vector<8x128xf32>
    tpu.vector_store %arg9[%c173, %c0_29], %47 {strides = array<i32>} : memref<200x128xf32, #tpu.memory_space<vmem>>, vector<8x128xf32>,
    %49 = vector.extract_strided_slice %11 {offsets = [7, 0, 0], sizes = [1, 16, 128], strides = [1, 1, 1]} : vector<8x16x128xf32> to vector<1x16x128xf32>
    %50 = vector.shape_cast %49 : vector<1x16x128xf32> to vector<16x128xf32>
    %c169 = arith.constant 169 : index
    %c0_30 = arith.constant 0 : index
    %51 = vector.load %arg10[%c169, %c0_30] : memref<200x128xf32, #tpu.memory_space<vmem>>, vector<16x128xf32>
    tpu.vector_store %arg10[%c169, %c0_30], %50 {strides = array<i32>} : memref<200x128xf32, #tpu.memory_space<vmem>>, vector<16x128xf32>,
    %cst_31 = arith.constant 0.000000e+00 : f32
    %52 = vector.broadcast %cst_31 : f32 to vector<192x128xf32>
    %c0_32 = arith.constant 0 : index
    %c0_33 = arith.constant 0 : index
    %53 = vector.load %arg9[%c0_32, %c0_33] : memref<200x128xf32, #tpu.memory_space<vmem>>, vector<192x128xf32>
    %c0_34 = arith.constant 0 : index
    %c0_35 = arith.constant 0 : index
    %c0_36 = arith.constant 0 : index
    %54 = vector.load %arg4[%c0_34, %c0_35, %c0_36] : memref<3x128x128xf32, #tpu.memory_space<vmem>>, vector<1x128x128xf32>
    %55 = vector.shape_cast %54 : vector<1x128x128xf32> to vector<128x128xf32>
    %cst_37 = arith.constant dense<0.000000e+00> : vector<192x128xf32>
    %56 = tpu.matmul %53, %55, %cst_37 {dimension_numbers = #tpu.dot_dimension_numbers<[1], [0], [0], [1], [0, 0, 1, 1], [], []>} : vector<192x128xf32>, vector<128x128xf32>, vector<192x128xf32> -> vector<192x128xf32>
    %57 = arith.addf %52, %56 : vector<192x128xf32>
    %c1_38 = arith.constant 1 : index
    %c0_39 = arith.constant 0 : index
    %58 = vector.load %arg9[%c1_38, %c0_39] : memref<200x128xf32, #tpu.memory_space<vmem>>, vector<192x128xf32>
    %c1_40 = arith.constant 1 : index
    %c0_41 = arith.constant 0 : index
    %c0_42 = arith.constant 0 : index
    %59 = vector.load %arg4[%c1_40, %c0_41, %c0_42] : memref<3x128x128xf32, #tpu.memory_space<vmem>>, vector<1x128x128xf32>
    %60 = vector.shape_cast %59 : vector<1x128x128xf32> to vector<128x128xf32>
    %cst_43 = arith.constant dense<0.000000e+00> : vector<192x128xf32>
    %61 = tpu.matmul %58, %60, %cst_43 {dimension_numbers = #tpu.dot_dimension_numbers<[1], [0], [0], [1], [0, 0, 1, 1], [], []>} : vector<192x128xf32>, vector<128x128xf32>, vector<192x128xf32> -> vector<192x128xf32>
    %62 = arith.addf %57, %61 : vector<192x128xf32>
    %c2 = arith.constant 2 : index
    %c0_44 = arith.constant 0 : index
    %63 = vector.load %arg9[%c2, %c0_44] : memref<200x128xf32, #tpu.memory_space<vmem>>, vector<192x128xf32>
    %c2_45 = arith.constant 2 : index
    %c0_46 = arith.constant 0 : index
    %c0_47 = arith.constant 0 : index
    %64 = vector.load %arg4[%c2_45, %c0_46, %c0_47] : memref<3x128x128xf32, #tpu.memory_space<vmem>>, vector<1x128x128xf32>
    %65 = vector.shape_cast %64 : vector<1x128x128xf32> to vector<128x128xf32>
    %cst_48 = arith.constant dense<0.000000e+00> : vector<192x128xf32>
    %66 = tpu.matmul %63, %65, %cst_48 {dimension_numbers = #tpu.dot_dimension_numbers<[1], [0], [0], [1], [0, 0, 1, 1], [], []>} : vector<192x128xf32>, vector<128x128xf32>, vector<192x128xf32> -> vector<192x128xf32>
    %67 = arith.addf %62, %66 : vector<192x128xf32>
    %c0_49 = arith.constant 0 : index
    %c0_50 = arith.constant 0 : index
    %68 = vector.load %arg10[%c0_49, %c0_50] : memref<200x128xf32, #tpu.memory_space<vmem>>, vector<192x128xf32>
    %c0_51 = arith.constant 0 : index
    %c0_52 = arith.constant 0 : index
    %c0_53 = arith.constant 0 : index
    %69 = vector.load %arg5[%c0_51, %c0_52, %c0_53] : memref<3x128x128xf32, #tpu.memory_space<vmem>>, vector<1x128x128xf32>
    %70 = vector.shape_cast %69 : vector<1x128x128xf32> to vector<128x128xf32>
    %cst_54 = arith.constant dense<0.000000e+00> : vector<192x128xf32>
    %71 = tpu.matmul %68, %70, %cst_54 {dimension_numbers = #tpu.dot_dimension_numbers<[1], [0], [0], [1], [0, 0, 1, 1], [], []>} : vector<192x128xf32>, vector<128x128xf32>, vector<192x128xf32> -> vector<192x128xf32>
    %72 = arith.addf %67, %71 : vector<192x128xf32>
    %c1_55 = arith.constant 1 : index
    %c0_56 = arith.constant 0 : index
    %73 = vector.load %arg10[%c1_55, %c0_56] : memref<200x128xf32, #tpu.memory_space<vmem>>, vector<192x128xf32>
    %c1_57 = arith.constant 1 : index
    %c0_58 = arith.constant 0 : index
    %c0_59 = arith.constant 0 : index
    %74 = vector.load %arg5[%c1_57, %c0_58, %c0_59] : memref<3x128x128xf32, #tpu.memory_space<vmem>>, vector<1x128x128xf32>
    %75 = vector.shape_cast %74 : vector<1x128x128xf32> to vector<128x128xf32>
    %cst_60 = arith.constant dense<0.000000e+00> : vector<192x128xf32>
    %76 = tpu.matmul %73, %75, %cst_60 {dimension_numbers = #tpu.dot_dimension_numbers<[1], [0], [0], [1], [0, 0, 1, 1], [], []>} : vector<192x128xf32>, vector<128x128xf32>, vector<192x128xf32> -> vector<192x128xf32>
    %77 = arith.addf %72, %76 : vector<192x128xf32>
    %c2_61 = arith.constant 2 : index
    %c0_62 = arith.constant 0 : index
    %78 = vector.load %arg10[%c2_61, %c0_62] : memref<200x128xf32, #tpu.memory_space<vmem>>, vector<192x128xf32>
    %c2_63 = arith.constant 2 : index
    %c0_64 = arith.constant 0 : index
    %c0_65 = arith.constant 0 : index
    %79 = vector.load %arg5[%c2_63, %c0_64, %c0_65] : memref<3x128x128xf32, #tpu.memory_space<vmem>>, vector<1x128x128xf32>
    %80 = vector.shape_cast %79 : vector<1x128x128xf32> to vector<128x128xf32>
    %cst_66 = arith.constant dense<0.000000e+00> : vector<192x128xf32>
    %81 = tpu.matmul %78, %80, %cst_66 {dimension_numbers = #tpu.dot_dimension_numbers<[1], [0], [0], [1], [0, 0, 1, 1], [], []>} : vector<192x128xf32>, vector<128x128xf32>, vector<192x128xf32> -> vector<192x128xf32>
    %82 = arith.addf %77, %81 : vector<192x128xf32>
    %c1_67 = arith.constant 1 : index
    %c0_68 = arith.constant 0 : index
    %83 = vector.load %arg7[%c1_67, %c0_68] : memref<3x128xf32, #tpu.memory_space<vmem>>, vector<1x128xf32>
    %84 = vector.broadcast %83 : vector<1x128xf32> to vector<192x128xf32>
    %85 = arith.addf %82, %84 : vector<192x128xf32>
    %cst_69 = arith.constant 0.000000e+00 : f32
    %86 = vector.broadcast %cst_69 : f32 to vector<192x128xf32>
    %87 = arith.maximumf %85, %86 : vector<192x128xf32>
    %88 = vector.extract_strided_slice %87 {offsets = [0, 0], sizes = [16, 128], strides = [1, 1]} : vector<192x128xf32> to vector<16x128xf32>
    %c1_70 = arith.constant 1 : index
    %c0_71 = arith.constant 0 : index
    %89 = vector.load %arg9[%c1_70, %c0_71] : memref<200x128xf32, #tpu.memory_space<vmem>>, vector<16x128xf32>
    tpu.vector_store %arg9[%c1_70, %c0_71], %88 {strides = array<i32>} : memref<200x128xf32, #tpu.memory_space<vmem>>, vector<16x128xf32>,
    %90 = vector.extract_strided_slice %87 {offsets = [24, 0], sizes = [16, 128], strides = [1, 1]} : vector<192x128xf32> to vector<16x128xf32>
    %c25_72 = arith.constant 25 : index
    %c0_73 = arith.constant 0 : index
    %91 = vector.load %arg9[%c25_72, %c0_73] : memref<200x128xf32, #tpu.memory_space<vmem>>, vector<16x128xf32>
    tpu.vector_store %arg9[%c25_72, %c0_73], %90 {strides = array<i32>} : memref<200x128xf32, #tpu.memory_space<vmem>>, vector<16x128xf32>,
    %92 = vector.extract_strided_slice %87 {offsets = [48, 0], sizes = [16, 128], strides = [1, 1]} : vector<192x128xf32> to vector<16x128xf32>
    %c49_74 = arith.constant 49 : index
    %c0_75 = arith.constant 0 : index
    %93 = vector.load %arg9[%c49_74, %c0_75] : memref<200x128xf32, #tpu.memory_space<vmem>>, vector<16x128xf32>
    tpu.vector_store %arg9[%c49_74, %c0_75], %92 {strides = array<i32>} : memref<200x128xf32, #tpu.memory_space<vmem>>, vector<16x128xf32>,
    %94 = vector.extract_strided_slice %87 {offsets = [72, 0], sizes = [16, 128], strides = [1, 1]} : vector<192x128xf32> to vector<16x128xf32>
    %c73_76 = arith.constant 73 : index
    %c0_77 = arith.constant 0 : index
    %95 = vector.load %arg9[%c73_76, %c0_77] : memref<200x128xf32, #tpu.memory_space<vmem>>, vector<16x128xf32>
    tpu.vector_store %arg9[%c73_76, %c0_77], %94 {strides = array<i32>} : memref<200x128xf32, #tpu.memory_space<vmem>>, vector<16x128xf32>,
    %96 = vector.extract_strided_slice %87 {offsets = [96, 0], sizes = [16, 128], strides = [1, 1]} : vector<192x128xf32> to vector<16x128xf32>
    %c97_78 = arith.constant 97 : index
    %c0_79 = arith.constant 0 : index
    %97 = vector.load %arg9[%c97_78, %c0_79] : memref<200x128xf32, #tpu.memory_space<vmem>>, vector<16x128xf32>
    tpu.vector_store %arg9[%c97_78, %c0_79], %96 {strides = array<i32>} : memref<200x128xf32, #tpu.memory_space<vmem>>, vector<16x128xf32>,
    %98 = vector.extract_strided_slice %87 {offsets = [120, 0], sizes = [16, 128], strides = [1, 1]} : vector<192x128xf32> to vector<16x128xf32>
    %c121_80 = arith.constant 121 : index
    %c0_81 = arith.constant 0 : index
    %99 = vector.load %arg9[%c121_80, %c0_81] : memref<200x128xf32, #tpu.memory_space<vmem>>, vector<16x128xf32>
    tpu.vector_store %arg9[%c121_80, %c0_81], %98 {strides = array<i32>} : memref<200x128xf32, #tpu.memory_space<vmem>>, vector<16x128xf32>,
    %100 = vector.extract_strided_slice %87 {offsets = [144, 0], sizes = [16, 128], strides = [1, 1]} : vector<192x128xf32> to vector<16x128xf32>
    %c145_82 = arith.constant 145 : index
    %c0_83 = arith.constant 0 : index
    %101 = vector.load %arg9[%c145_82, %c0_83] : memref<200x128xf32, #tpu.memory_space<vmem>>, vector<16x128xf32>
    tpu.vector_store %arg9[%c145_82, %c0_83], %100 {strides = array<i32>} : memref<200x128xf32, #tpu.memory_space<vmem>>, vector<16x128xf32>,
    %102 = vector.extract_strided_slice %87 {offsets = [168, 0], sizes = [16, 128], strides = [1, 1]} : vector<192x128xf32> to vector<16x128xf32>
    %c169_84 = arith.constant 169 : index
    %c0_85 = arith.constant 0 : index
    %103 = vector.load %arg9[%c169_84, %c0_85] : memref<200x128xf32, #tpu.memory_space<vmem>>, vector<16x128xf32>
    tpu.vector_store %arg9[%c169_84, %c0_85], %102 {strides = array<i32>} : memref<200x128xf32, #tpu.memory_space<vmem>>, vector<16x128xf32>,
    %cst_86 = arith.constant 0.000000e+00 : f32
    %104 = vector.broadcast %cst_86 : f32 to vector<192x128xf32>
    %c0_87 = arith.constant 0 : index
    %c0_88 = arith.constant 0 : index
    %105 = vector.load %arg9[%c0_87, %c0_88] : memref<200x128xf32, #tpu.memory_space<vmem>>, vector<192x128xf32>
    %c0_89 = arith.constant 0 : index
    %c0_90 = arith.constant 0 : index
    %c0_91 = arith.constant 0 : index
    %106 = vector.load %arg6[%c0_89, %c0_90, %c0_91] : memref<3x128x128xf32, #tpu.memory_space<vmem>>, vector<1x128x128xf32>
    %107 = vector.shape_cast %106 : vector<1x128x128xf32> to vector<128x128xf32>
    %cst_92 = arith.constant dense<0.000000e+00> : vector<192x128xf32>
    %108 = tpu.matmul %105, %107, %cst_92 {dimension_numbers = #tpu.dot_dimension_numbers<[1], [0], [0], [1], [0, 0, 1, 1], [], []>} : vector<192x128xf32>, vector<128x128xf32>, vector<192x128xf32> -> vector<192x128xf32>
    %109 = arith.addf %104, %108 : vector<192x128xf32>
    %c1_93 = arith.constant 1 : index
    %c0_94 = arith.constant 0 : index
    %110 = vector.load %arg9[%c1_93, %c0_94] : memref<200x128xf32, #tpu.memory_space<vmem>>, vector<192x128xf32>
    %c1_95 = arith.constant 1 : index
    %c0_96 = arith.constant 0 : index
    %c0_97 = arith.constant 0 : index
    %111 = vector.load %arg6[%c1_95, %c0_96, %c0_97] : memref<3x128x128xf32, #tpu.memory_space<vmem>>, vector<1x128x128xf32>
    %112 = vector.shape_cast %111 : vector<1x128x128xf32> to vector<128x128xf32>
    %cst_98 = arith.constant dense<0.000000e+00> : vector<192x128xf32>
    %113 = tpu.matmul %110, %112, %cst_98 {dimension_numbers = #tpu.dot_dimension_numbers<[1], [0], [0], [1], [0, 0, 1, 1], [], []>} : vector<192x128xf32>, vector<128x128xf32>, vector<192x128xf32> -> vector<192x128xf32>
    %114 = arith.addf %109, %113 : vector<192x128xf32>
    %c2_99 = arith.constant 2 : index
    %c0_100 = arith.constant 0 : index
    %115 = vector.load %arg9[%c2_99, %c0_100] : memref<200x128xf32, #tpu.memory_space<vmem>>, vector<192x128xf32>
    %c2_101 = arith.constant 2 : index
    %c0_102 = arith.constant 0 : index
    %c0_103 = arith.constant 0 : index
    %116 = vector.load %arg6[%c2_101, %c0_102, %c0_103] : memref<3x128x128xf32, #tpu.memory_space<vmem>>, vector<1x128x128xf32>
    %117 = vector.shape_cast %116 : vector<1x128x128xf32> to vector<128x128xf32>
    %cst_104 = arith.constant dense<0.000000e+00> : vector<192x128xf32>
    %118 = tpu.matmul %115, %117, %cst_104 {dimension_numbers = #tpu.dot_dimension_numbers<[1], [0], [0], [1], [0, 0, 1, 1], [], []>} : vector<192x128xf32>, vector<128x128xf32>, vector<192x128xf32> -> vector<192x128xf32>
    %119 = arith.addf %114, %118 : vector<192x128xf32>
    %c2_105 = arith.constant 2 : index
    %c0_106 = arith.constant 0 : index
    %120 = vector.load %arg7[%c2_105, %c0_106] : memref<3x128xf32, #tpu.memory_space<vmem>>, vector<1x128xf32>
    %121 = vector.broadcast %120 : vector<1x128xf32> to vector<192x128xf32>
    %122 = arith.addf %119, %121 : vector<192x128xf32>
    %cst_107 = arith.constant 0.000000e+00 : f32
    %123 = vector.broadcast %cst_107 : f32 to vector<192x128xf32>
    %124 = arith.maximumf %122, %123 : vector<192x128xf32>
    %125 = vector.shape_cast %124 : vector<192x128xf32> to vector<8x24x128xf32>
    %126 = vector.extract_strided_slice %125 {offsets = [0, 0, 0], sizes = [8, 16, 128], strides = [1, 1, 1]} : vector<8x24x128xf32> to vector<8x16x128xf32>
    %c0_108 = arith.constant 0 : index
    %c0_109 = arith.constant 0 : index
    %c0_110 = arith.constant 0 : index
    %127 = vector.load %arg8[%c0_108, %c0_109, %c0_110] : memref<8x16x128xf32, #tpu.memory_space<vmem>>, vector<8x16x128xf32>
    tpu.vector_store %arg8[%c0_108, %c0_109, %c0_110], %126 {strides = array<i32>} : memref<8x16x128xf32, #tpu.memory_space<vmem>>, vector<8x16x128xf32>,
    return
  }
  func.func @transform_0(%arg0: i32) -> (i32, i32, i32) {
    %c0_i32 = arith.constant 0 : i32
    %c0_i32_0 = arith.constant 0 : i32
    %c0_i32_1 = arith.constant 0 : i32
    return %arg0, %c0_i32, %c0_i32_0 : i32, i32, i32
  }
  func.func @transform_1(%arg0: i32) -> (i32, i32, i32) {
    %c0_i32 = arith.constant 0 : i32
    %c0_i32_0 = arith.constant 0 : i32
    %c0_i32_1 = arith.constant 0 : i32
    return %arg0, %c0_i32, %c0_i32_0 : i32, i32, i32
  }
  func.func @transform_2(%arg0: i32) -> (i32, i32) {
    %c0_i32 = arith.constant 0 : i32
    %c0_i32_0 = arith.constant 0 : i32
    %c0_i32_1 = arith.constant 0 : i32
    return %c0_i32, %c0_i32_0 : i32, i32
  }
  func.func @transform_3(%arg0: i32) -> (i32, i32, i32) {
    %c0_i32 = arith.constant 0 : i32
    %c0_i32_0 = arith.constant 0 : i32
    %c0_i32_1 = arith.constant 0 : i32
    %c0_i32_2 = arith.constant 0 : i32
    return %c0_i32, %c0_i32_0, %c0_i32_1 : i32, i32, i32
  }
  func.func @transform_4(%arg0: i32) -> (i32, i32, i32) {
    %c0_i32 = arith.constant 0 : i32
    %c0_i32_0 = arith.constant 0 : i32
    %c0_i32_1 = arith.constant 0 : i32
    %c0_i32_2 = arith.constant 0 : i32
    return %c0_i32, %c0_i32_0, %c0_i32_1 : i32, i32, i32
  }
  func.func @transform_5(%arg0: i32) -> (i32, i32, i32) {
    %c0_i32 = arith.constant 0 : i32
    %c0_i32_0 = arith.constant 0 : i32
    %c0_i32_1 = arith.constant 0 : i32
    %c0_i32_2 = arith.constant 0 : i32
    return %c0_i32, %c0_i32_0, %c0_i32_1 : i32, i32, i32
  }
  func.func @transform_6(%arg0: i32) -> (i32, i32) {
    %c0_i32 = arith.constant 0 : i32
    %c0_i32_0 = arith.constant 0 : i32
    %c0_i32_1 = arith.constant 0 : i32
    return %c0_i32, %c0_i32_0 : i32, i32
  }
  func.func @transform_7(%arg0: i32) -> (i32, i32, i32) {
    %c0_i32 = arith.constant 0 : i32
    %c0_i32_0 = arith.constant 0 : i32
    %c0_i32_1 = arith.constant 0 : i32
    return %arg0, %c0_i32, %c0_i32_0 : i32, i32, i32
  }
}

</mosaic_0001>

<bundles_post_ra>
// kernel: upblock_pallas.1
= control target key start
LH: loop header
LB: loop body
LE: loop exit
PB: predicated region body
PF: predicated region fallthrough
CT: control target
= control target key end

     0   :  { %v3915_v3 = vmov 0.0   ;;  %s4800_s2 = inlined_call_operand.vmem [shape: f32[128,128], index: 2, kind: input, shape index: {}]   ;;  %s4801_s0 = inlined_call_operand.vmem [shape: f32[8,8,128], index: 0, kind: input, shape index: {}]   ;;  %s4802_s3 = inlined_call_operand.vmem [shape: f32[3,128,128], index: 3, kind: input, shape index: {}]   ;;  %s4803_s1 = inlined_call_operand.vmem [shape: f32[8,16,128], index: 1, kind: input, shape index: {}]   ;;  %s4804_s6 = inlined_call_operand.vmem [shape: f32[3,128], index: 6, kind: input, shape index: {}]   ;;  %s4805_s4 = inlined_call_operand.vmem [shape: f32[3,128,128], index: 4, kind: input, shape index: {}]   ;;  %s4806_s5 = inlined_call_operand.vmem [shape: f32[3,128,128], index: 5, kind: input, shape index: {}]   ;;  %s4807_s7 = inlined_call_operand.vmem [shape: f32[8,16,128], index: 7, kind: output, shape index: {}]  }
   0x1   :  { %v84_v0 = vld [vmem:[%s4800_s2] sm:$0xff]  ;;  %v85_v1 = vld [vmem:[%s4800_s2 + $0x8] sm:$0xff]  ;;  %v86_v2 = vld [vmem:[%s4800_s2 + $0x10] sm:$0xff]  ;;  %29 = vst [vmem:[#allocation2 + $0x18] sm:$0xff] %v3915_v3 }
   0x2   :  { %30 = vst [vmem:[#allocation2 + $0x20] sm:$0xff] %v3915_v3  ;;  %26 = vst [vmem:[#allocation2] sm:$0xff] %v3915_v3  ;;  %v3538_v4 = vpack.c.bf16 %v85_v1, %v84_v0  ;;  %v87_v5 = vld [vmem:[%s4800_s2 + $0x18] sm:$0xff]  ;;  %v88_v7 = vld [vmem:[%s4800_s2 + $0x20] sm:$0xff] }
   0x3   :  { %27 = vst [vmem:[#allocation2 + $0x8] sm:$0xff] %v3915_v3  ;;  %28 = vst [vmem:[#allocation2 + $0x10] sm:$0xff] %v3915_v3  ;;  %v3542_v6 = vpack.c.bf16 %v87_v5, %v86_v2  ;;  %v89_v8 = vld [vmem:[%s4800_s2 + $0x28] sm:$0xff]  ;;  %v76_v10 = vld [vmem:[%s4801_s0] sm:$0xff] }
   0x4   :  { %31 = vst [vmem:[#allocation2 + $0x28] sm:$0xff] %v3915_v3  ;;  %32 = vst [vmem:[#allocation2 + $0x30] sm:$0xff] %v3915_v3  ;;  %3539 = vmatprep.subr.bf16.mxu0 %v3538_v4  ;;  %v3546_v9 = vpack.c.bf16 %v89_v8, %v88_v7  ;;  %v90_v11 = vld [vmem:[%s4800_s2 + $0x30] sm:$0xff]  ;;  %v91_v12 = vld [vmem:[%s4800_s2 + $0x38] sm:$0xff]  ;;  %2914 = vmatprep.mubr.f32.mxu0 %v76_v10 }
   0x5   :  { %33 = vst [vmem:[#allocation2 + $0x38] sm:$0xff] %v3915_v3  ;;  %34 = vst [vmem:[#allocation2 + $0x40] sm:$0xff] %v3915_v3  ;;  %3541 = vmatpush3.bf16.msra.mxu0 %v3538_v4  ;;  %v274_v13 = vld [vmem:[%s4802_s3] sm:$0xff]  ;;  %v275_v14 = vld [vmem:[%s4802_s3 + $0x8] sm:$0xff]  ;;  %v3550_v15 = vpack.c.bf16 %v91_v12, %v90_v11 }
   0x6   :  { %35 = vst [vmem:[#allocation2 + $0x48] sm:$0xff] %v3915_v3  ;;  %36 = vst [vmem:[#allocation2 + $0x50] sm:$0xff] %v3915_v3  ;;  %3543 = vmatprep.subr.bf16.mxu0 %v3542_v6  ;;  %v3602_v16 = vpack.c.bf16 %v275_v14, %v274_v13  ;;  %v276_v17 = vld [vmem:[%s4802_s3 + $0x10] sm:$0xff]  ;;  %v277_v18 = vld [vmem:[%s4802_s3 + $0x18] sm:$0xff] }
   0x7   :  { %37 = vst [vmem:[#allocation2 + $0x58] sm:$0xff] %v3915_v3  ;;  %38 = vst [vmem:[#allocation2 + $0x60] sm:$0xff] %v3915_v3  ;;  %v92_v19 = vld [vmem:[%s4800_s2 + $0x40] sm:$0xff]  ;;  %v93_v20 = vld [vmem:[%s4800_s2 + $0x48] sm:$0xff]  ;;  %v3606_v21 = vpack.c.bf16 %v277_v18, %v276_v17 }
   0x8   :  { %39 = vst [vmem:[#allocation2 + $0x68] sm:$0xff] %v3915_v3  ;;  %40 = vst [vmem:[#allocation2 + $0x70] sm:$0xff] %v3915_v3  ;;  %v278_v22 = vld [vmem:[%s4802_s3 + $0x20] sm:$0xff]  ;;  %3603 = vmatprep.subr.bf16.mxu1 %v3602_v16  ;;  %v279_v23 = vld [vmem:[%s4802_s3 + $0x28] sm:$0xff]  ;;  %v3554_v24 = vpack.c.bf16 %v93_v20, %v92_v19 }
   0x9   :  { %41 = vst [vmem:[#allocation2 + $0x78] sm:$0xff] %v3915_v3  ;;  %42 = vst [vmem:[#allocation2 + $0x80] sm:$0xff] %v3915_v3  ;;  %3545 = vmatpush3.bf16.msra.mxu0 %v3542_v6  ;;  %3605 = vmatpush3.bf16.msra.mxu1 %v3602_v16  ;;  %v94_v25 = vld [vmem:[%s4800_s2 + $0x50] sm:$0xff]  ;;  %v3610_v26 = vpack.c.bf16 %v279_v23, %v278_v22  ;;  %v95_v27 = vld [vmem:[%s4800_s2 + $0x58] sm:$0xff] }
   0xa   :  { %43 = vst [vmem:[#allocation2 + $0x88] sm:$0xff] %v3915_v3  ;;  %44 = vst [vmem:[#allocation2 + $0x90] sm:$0xff] %v3915_v3  ;;  %3547 = vmatprep.subr.bf16.mxu0 %v3546_v9  ;;  %3607 = vmatprep.subr.bf16.mxu1 %v3606_v21  ;;  %v280_v28 = vld [vmem:[%s4802_s3 + $0x30] sm:$0xff]  ;;  %v281_v29 = vld [vmem:[%s4802_s3 + $0x38] sm:$0xff]  ;;  %v3558_v30 = vpack.c.bf16 %v95_v27, %v94_v25 }
   0xb   :  { %45 = vst [vmem:[#allocation2 + $0x98] sm:$0xff] %v3915_v3  ;;  %46 = vst [vmem:[#allocation2 + $0xa0] sm:$0xff] %v3915_v3  ;;  %v96_v31 = vld [vmem:[%s4800_s2 + $0x60] sm:$0xff]  ;;  %v3614_v32 = vpack.c.bf16 %v281_v29, %v280_v28  ;;  %v97_v33 = vld [vmem:[%s4800_s2 + $0x68] sm:$0xff] }
   0xc   :  { %47 = vst [vmem:[#allocation2 + $0xa8] sm:$0xff] %v3915_v3  ;;  %48 = vst [vmem:[#allocation2 + $0xb0] sm:$0xff] %v3915_v3  ;;  %v282_v34 = vld [vmem:[%s4802_s3 + $0x40] sm:$0xff]  ;;  %v283_v35 = vld [vmem:[%s4802_s3 + $0x48] sm:$0xff]  ;;  %v3562_v36 = vpack.c.bf16 %v97_v33, %v96_v31 }
   0xd   :  { %49 = vst [vmem:[#allocation2 + $0xb8] sm:$0xff] %v3915_v3  ;;  %50 = vst [vmem:[#allocation2 + $0xc0] sm:$0xff] %v3915_v3  ;;  %3549 = vmatpush3.bf16.msra.mxu0 %v3546_v9  ;;  %3609 = vmatpush3.bf16.msra.mxu1 %v3606_v21  ;;  %v3618_v37 = vpack.c.bf16 %v283_v35, %v282_v34  ;;  %v98_v38 = vld [vmem:[%s4800_s2 + $0x70] sm:$0xff]  ;;  %v99_v39 = vld [vmem:[%s4800_s2 + $0x78] sm:$0xff] }
   0xe   :  { %51 = vst [vmem:[#allocation3] sm:$0xff] %v3915_v3  ;;  %52 = vst [vmem:[#allocation3 + $0x8] sm:$0xff] %v3915_v3  ;;  %3551 = vmatprep.subr.bf16.mxu0 %v3550_v15  ;;  %3611 = vmatprep.subr.bf16.mxu1 %v3610_v26  ;;  %v3566_v40 = vpack.c.bf16 %v99_v39, %v98_v38  ;;  %v2400_v41 = vld [vmem:[%s4802_s3 + $0x80] sm:$0xff]  ;;  %v2401_v42 = vld [vmem:[%s4802_s3 + $0x88] sm:$0xff] }
   0xf   :  { %53 = vst [vmem:[#allocation3 + $0x10] sm:$0xff] %v3915_v3  ;;  %54 = vst [vmem:[#allocation3 + $0x18] sm:$0xff] %v3915_v3  ;;  %v3570_v43 = vpack.c.bf16 %v2401_v42, %v2400_v41  ;;  %v2402_v44 = vld [vmem:[%s4802_s3 + $0x90] sm:$0xff]  ;;  %v2403_v45 = vld [vmem:[%s4802_s3 + $0x98] sm:$0xff] }
  0x10   :  { %55 = vst [vmem:[#allocation3 + $0x20] sm:$0xff] %v3915_v3  ;;  %56 = vst [vmem:[#allocation3 + $0x28] sm:$0xff] %v3915_v3  ;;  %v77_v46 = vld [vmem:[%s4801_s0 + $0x8] sm:$0xff]  ;;  %v78_v47 = vld [vmem:[%s4801_s0 + $0x10] sm:$0xff]  ;;  %v3574_v48 = vpack.c.bf16 %v2403_v45, %v2402_v44 }
  0x11   :  { %57 = vst [vmem:[#allocation3 + $0x30] sm:$0xff] %v3915_v3  ;;  %58 = vst [vmem:[#allocation3 + $0x38] sm:$0xff] %v3915_v3  ;;  %3553 = vmatpush3.bf16.msra.mxu0 %v3550_v15  ;;  %3613 = vmatpush3.bf16.msra.mxu1 %v3610_v26  ;;  %v2404_v49 = vld [vmem:[%s4802_s3 + $0xa0] sm:$0xff]  ;;  %v2405_v50 = vld [vmem:[%s4802_s3 + $0xa8] sm:$0xff] }
  0x12   :  { %59 = vst [vmem:[#allocation3 + $0x40] sm:$0xff] %v3915_v3  ;;  %60 = vst [vmem:[#allocation3 + $0x48] sm:$0xff] %v3915_v3  ;;  %3555 = vmatprep.subr.bf16.mxu0 %v3554_v24  ;;  %3615 = vmatprep.subr.bf16.mxu1 %v3614_v32  ;;  %v79_v51 = vld [vmem:[%s4801_s0 + $0x18] sm:$0xff]  ;;  %v80_v52 = vld [vmem:[%s4801_s0 + $0x20] sm:$0xff]  ;;  %v3578_v53 = vpack.c.bf16 %v2405_v50, %v2404_v49 }
  0x13   :  { %61 = vst [vmem:[#allocation3 + $0x50] sm:$0xff] %v3915_v3  ;;  %62 = vst [vmem:[#allocation3 + $0x58] sm:$0xff] %v3915_v3  ;;  %v2406_v54 = vld [vmem:[%s4802_s3 + $0xb0] sm:$0xff]  ;;  %v2407_v55 = vld [vmem:[%s4802_s3 + $0xb8] sm:$0xff] }
  0x14   :  { %63 = vst [vmem:[#allocation3 + $0x60] sm:$0xff] %v3915_v3  ;;  %64 = vst [vmem:[#allocation3 + $0x68] sm:$0xff] %v3915_v3  ;;  %v81_v56 = vld [vmem:[%s4801_s0 + $0x28] sm:$0xff]  ;;  %v82_v57 = vld [vmem:[%s4801_s0 + $0x30] sm:$0xff]  ;;  %v3582_v58 = vpack.c.bf16 %v2407_v55, %v2406_v54 }
  0x15   :  { %65 = vst [vmem:[#allocation3 + $0x70] sm:$0xff] %v3915_v3  ;;  %66 = vst [vmem:[#allocation3 + $0x78] sm:$0xff] %v3915_v3  ;;  %3557 = vmatpush3.bf16.msra.mxu0 %v3554_v24  ;;  %3617 = vmatpush3.bf16.msra.mxu1 %v3614_v32  ;;  %v2408_v59 = vld [vmem:[%s4802_s3 + $0xc0] sm:$0xff]  ;;  %v2409_v60 = vld [vmem:[%s4802_s3 + $0xc8] sm:$0xff] }
  0x16   :  { %67 = vst [vmem:[#allocation3 + $0x80] sm:$0xff] %v3915_v3  ;;  %68 = vst [vmem:[#allocation3 + $0x88] sm:$0xff] %v3915_v3  ;;  %3559 = vmatprep.subr.bf16.mxu0 %v3558_v30  ;;  %3619 = vmatprep.subr.bf16.mxu1 %v3618_v37  ;;  %v83_v61 = vld [vmem:[%s4801_s0 + $0x38] sm:$0xff]  ;;  %v3586_v62 = vpack.c.bf16 %v2409_v60, %v2408_v59  ;;  %v284_v63 = vld [vmem:[%s4802_s3 + $0x50] sm:$0xff] }
  0x17   :  { %69 = vst [vmem:[#allocation3 + $0x90] sm:$0xff] %v3915_v3  ;;  %70 = vst [vmem:[#allocation3 + $0x98] sm:$0xff] %v3915_v3  ;;  %v285_v0 = vld [vmem:[%s4802_s3 + $0x58] sm:$0xff]  ;;  %v2410_v1 = vld [vmem:[%s4802_s3 + $0xd0] sm:$0xff] }
  0x18   :  { %71 = vst [vmem:[#allocation3 + $0xa0] sm:$0xff] %v3915_v3  ;;  %72 = vst [vmem:[#allocation3 + $0xa8] sm:$0xff] %v3915_v3  ;;  %v3622_v2 = vpack.c.bf16 %v285_v0, %v284_v63  ;;  %v2411_v4 = vld [vmem:[%s4802_s3 + $0xd8] sm:$0xff]  ;;  %v286_v6 = vld [vmem:[%s4802_s3 + $0x60] sm:$0xff] }
  0x19   :  { %73 = vst [vmem:[#allocation3 + $0xb0] sm:$0xff] %v3915_v3  ;;  %74 = vst [vmem:[#allocation3 + $0xb8] sm:$0xff] %v3915_v3  ;;  %3561 = vmatpush3.bf16.msra.mxu0 %v3558_v30  ;;  %3621 = vmatpush3.bf16.msra.mxu1 %v3618_v37  ;;  %v3590_v5 = vpack.c.bf16 %v2411_v4, %v2410_v1  ;;  %v287_v7 = vld [vmem:[%s4802_s3 + $0x68] sm:$0xff]  ;;  %v2412_v8 = vld [vmem:[%s4802_s3 + $0xe0] sm:$0xff] }
  0x1a   :  { %75 = vst [vmem:[#allocation3 + $0xc0] sm:$0xff] %v3915_v3  ;;  %3563 = vmatprep.subr.bf16.mxu0 %v3562_v36  ;;  %3623 = vmatprep.subr.bf16.mxu1 %v3622_v2  ;;  %v3626_v9 = vpack.c.bf16 %v287_v7, %v286_v6  ;;  %v2413_v10 = vld [vmem:[%s4802_s3 + $0xe8] sm:$0xff]  ;;  %v288_v12 = vld [vmem:[%s4802_s3 + $0x70] sm:$0xff]  ;;  %v289_v13 = vld [vmem:[%s4802_s3 + $0x78] sm:$0xff] }
  0x1b   :  { %v3594_v11 = vpack.c.bf16 %v2413_v10, %v2412_v8  ;;  %v2414_v14 = vld [vmem:[%s4802_s3 + $0xf0] sm:$0xff]  ;;  %v3630_v15 = vpack.c.bf16 %v289_v13, %v288_v12  ;;  %v2415_v16 = vld [vmem:[%s4802_s3 + $0xf8] sm:$0xff]  ;;  %v2416_v18 = vld [vmem:[%s4802_s3 + $0x100] sm:$0xff] }
  0x1c   :  { %v3598_v17 = vpack.c.bf16 %v2415_v16, %v2414_v14  ;;  %v2417_v19 = vld [vmem:[%s4802_s3 + $0x108] sm:$0xff]  ;;  %v4186_v21 = vld [vmem:[%s4803_s1] sm:$0xff]  ;;  %v4198_v23 = vld [vmem:[%s4803_s1 + $0x10] sm:$0xff] }
  0x1d   :  { %3565 = vmatpush3.bf16.msra.mxu0 %v3562_v36  ;;  %3625 = vmatpush3.bf16.msra.mxu1 %v3622_v2  ;;  %v4180_v20 = vpack.c.bf16 %v2417_v19, %v2416_v18  ;;  %v4191_v22 = vld [vmem:[%s4803_s1 + $0x8] sm:$0xff]  ;;  %227 = vst [vmem:[#allocation3 + $0x1] sm:$0xff] %v4186_v21  ;;  %230 = vst [vmem:[#allocation3 + $0x19] sm:$0xff] %v4198_v23  ;;  %v4204_v24 = vld [vmem:[%s4803_s1 + $0x18] sm:$0xff] }
  0x1e   :  { %3567 = vmatprep.subr.bf16.mxu0 %v3566_v40  ;;  %3627 = vmatprep.subr.bf16.mxu1 %v3626_v9  ;;  %228 = vst [vmem:[#allocation3 + $0x9] sm:$0xff] %v4191_v22  ;;  %231 = vst [vmem:[#allocation3 + $0x21] sm:$0xff] %v4204_v24  ;;  %v4210_v25 = vld [vmem:[%s4803_s1 + $0x20] sm:$0xff]  ;;  %v4216_v26 = vld [vmem:[%s4803_s1 + $0x28] sm:$0xff] }
  0x1f   :  { %233 = vst [vmem:[#allocation3 + $0x31] sm:$0xff] %v4210_v25  ;;  %234 = vst [vmem:[#allocation3 + $0x39] sm:$0xff] %v4216_v26  ;;  %v4222_v27 = vld [vmem:[%s4803_s1 + $0x30] sm:$0xff]  ;;  %v4228_v28 = vld [vmem:[%s4803_s1 + $0x38] sm:$0xff] }
  0x20   :  { %236 = vst [vmem:[#allocation3 + $0x49] sm:$0xff] %v4222_v27  ;;  %237 = vst [vmem:[#allocation3 + $0x51] sm:$0xff] %v4228_v28  ;;  %v2399_v29 = vld [vmem:[%s4804_s6] ss:$0 sm:$0xff]  ;;  %v4243_v31 = vld [vmem:[%s4803_s1 + $0x48] sm:$0xff] }
  0x21   :  { %3569 = vmatpush3.bf16.msra.mxu0 %v3566_v40  ;;  %3629 = vmatpush3.bf16.msra.mxu1 %v3626_v9  ;;  %v4237_v30 = vld [vmem:[%s4803_s1 + $0x40] sm:$0xff]  ;;  %240 = vst [vmem:[#allocation3 + $0x69] sm:$0xff] %v4243_v31  ;;  %v4249_v36 = vld [vmem:[%s4803_s1 + $0x50] sm:$0xff]  ;;  %v4255_v41 = vld [vmem:[%s4803_s1 + $0x58] sm:$0xff] }
  0x22   :  { %3571 = vmatprep.subr.bf16.mxu0 %v3570_v43  ;;  %3631 = vmatprep.subr.bf16.mxu1 %v3630_v15  ;;  %239 = vst [vmem:[#allocation3 + $0x61] sm:$0xff] %v4237_v30  ;;  %242 = vst [vmem:[#allocation3 + $0x79] sm:$0xff] %v4249_v36  ;;  %v2418_v42 = vld [vmem:[%s4802_s3 + $0x110] sm:$0xff]  ;;  %v2420_v55 = vld [vmem:[%s4802_s3 + $0x120] sm:$0xff] }
  0x23   :  { %243 = vst [vmem:[#allocation3 + $0x81] sm:$0xff] %v4255_v41  ;;  %v2422_v63 = vld [vmem:[%s4802_s3 + $0x130] sm:$0xff]  ;;  %v2423_v2 = vld [vmem:[%s4802_s3 + $0x138] sm:$0xff]  ;;  %v2424_v8 = vld [vmem:[%s4802_s3 + $0x140] sm:$0xff] }
  0x24   :  { %2915 = vmatmul.mubr.f32.vlgmr.msra.gmra.mrb[0].mxu0 %v77_v46  ;;  %v295_v4 = vld [vmem:[#allocation2 + $0x29] sm:$0xff]  ;;  %v3646_v7 = vpack.c.bf16 %v2423_v2, %v2422_v63  ;;  %v298_v10 = vld [vmem:[#allocation2 + $0x41] sm:$0xff]  ;;  %v313_v2 = vld [vmem:[#allocation2 + $0xb9] sm:$0xff] }
  0x25   :  { %2917 = vmatprep.mubr.f32.mxu0 %v78_v47  ;;  %3573 = vmatpush3.bf16.msra.mxu0 %v3570_v43  ;;  %v2419_v43 = vld [vmem:[%s4802_s3 + $0x118] sm:$0xff]  ;;  %v2425_v9 = vld [vmem:[%s4802_s3 + $0x148] sm:$0xff]  ;;  %v2426_v14 = vld [vmem:[%s4802_s3 + $0x150] sm:$0xff] }
  0x26   :  { %3575 = vmatprep.subr.bf16.mxu0 %v3574_v48  ;;  %3633 = vmatpush3.bf16.msra.mxu1 %v3630_v15  ;;  %v292_v47 = vld [vmem:[#allocation2 + $0x11] sm:$0xff]  ;;  %v3650_v13 = vpack.c.bf16 %v2425_v9, %v2424_v8  ;;  %v2429_v18 = vld [vmem:[%s4802_s3 + $0x168] sm:$0xff]  ;;  %v4301_v19 = vld [vmem:[%s4803_s1 + $0x60] sm:$0xff] }
  0x27   :  { %3635 = vmatprep.subr.bf16.mxu1 %v4180_v20  ;;  %v2427_v15 = vld [vmem:[%s4802_s3 + $0x158] sm:$0xff]  ;;  %245 = vst [vmem:[#allocation3 + $0x91] sm:$0xff] %v4301_v19 }
  0x28   :  { %2918 = vmatmul.mubr.f32.gmra.mrb[2].mxu0 %v79_v51 }
  0x29   :  { %2920 = vmatprep.mubr.f32.mxu0 %v80_v52  ;;  %3577 = vmatpush3.bf16.msra.mxu0 %v3574_v48  ;;  %v3638_v52 = vpack.c.bf16 %v2419_v43, %v2418_v42  ;;  %v2430_v43 = vld [vmem:[%s4802_s3 + $0x170] sm:$0xff] }
  0x2a   :  { %3579 = vmatprep.subr.bf16.mxu0 %v3578_v53 }
  0x2c   :  { %2921 = vmatmul.mubr.f32.gmra.mrb[4].mxu0 %v81_v56  ;;  %v2421_v56 = vld [vmem:[%s4802_s3 + $0x128] sm:$0xff] }
  0x2d   :  { %2923 = vmatprep.mubr.f32.mxu0 %v82_v57  ;;  %3581 = vmatpush3.bf16.msra.mxu0 %v3578_v53 }
  0x2e   :  { %3583 = vmatprep.subr.bf16.mxu0 %v3582_v58 }
  0x30   :  { %2924 = vmatmul.mubr.f32.gmra.mrb[6].mxu0 %v83_v61 }
  0x31   :  { %3585 = vmatpush3.bf16.msra.mxu0 %v3582_v58 }
  0x32   :  { %3587 = vmatprep.subr.bf16.mxu0 %v3586_v62 }
  0x35   :  { %3589 = vmatpush3.bf16.msra.mxu0 %v3586_v62  ;;  %v3642_v62 = vpack.c.bf16 %v2421_v56, %v2420_v55  ;;  %v307_v56 = vld [vmem:[#allocation2 + $0x89] sm:$0xff] }
  0x36   :  { %3591 = vmatprep.subr.bf16.mxu0 %v3590_v5 }
  0x39   :  { %3593 = vmatpush3.bf16.msra.mxu0 %v3590_v5 }
  0x3a   :  { %3595 = vmatprep.subr.bf16.mxu0 %v3594_v11 }
  0x3d   :  { %3597 = vmatpush3.bf16.msra.mxu0 %v3594_v11 }
  0x3e   :  { %3599 = vmatprep.subr.bf16.mxu0 %v3598_v17 }
  0x41   :  { %3601 = vmatpush3.bf16.msra.mxu0 %v3598_v17  ;;  %v2428_v17 = vld [vmem:[%s4802_s3 + $0x160] sm:$0xff] }
  0x42   :  { %v3658_v42 = vpack.c.bf16 %v2429_v18, %v2428_v17  ;;  %v951_v18 = vld [vmem:[%s4805_s4 + $0x40] sm:$0xff] }
  0xf7   :  { %v2916_v32 = vpop.f32.mrb[0].mxu0 }
  0xf8   :  { %v177_v33 = vadd.f32 %v2916_v32, %v2399_v29  ;;  %v171_v34 = vpop.f32.mrb[1].mxu0  ;;  %v4307_v32 = vld [vmem:[%s4803_s1 + $0x68] sm:$0xff] }
  0xf9   :  { %v172_v35 = vadd.f32 %v2399_v29, %v171_v34  ;;  %246 = vst [vmem:[#allocation3 + $0x99] sm:$0xff] %v4307_v32 }
  0xfa   :  { %229 = vst [vmem:[#allocation2 + $0x1d] sm:$0xff] %v177_v33  ;;  %v4312_v33 = vld [vmem:[%s4803_s1 + $0x70] sm:$0xff] }
  0xfb   :  { %226 = vst [vmem:[#allocation2 + $0x5] sm:$0xff] %v172_v35  ;;  %v2919_v37 = vpop.f32.mrb[2].mxu0  ;;  %248 = vst [vmem:[#allocation3 + $0xa9] sm:$0xff] %v4312_v33 }
  0xfc   :  { %v187_v38 = vadd.f32 %v2919_v37, %v2399_v29  ;;  %v181_v39 = vpop.f32.mrb[3].mxu0  ;;  %v4319_v37 = vld [vmem:[%s4803_s1 + $0x78] sm:$0xff] }
  0xfd   :  { %v182_v40 = vadd.f32 %v2399_v29, %v181_v39  ;;  %249 = vst [vmem:[#allocation3 + $0xb1] sm:$0xff] %v4319_v37 }
  0xfe   :  { %235 = vst [vmem:[#allocation2 + $0x4d] sm:$0xff] %v187_v38  ;;  %v301_v38 = vld [vmem:[#allocation2 + $0x59] sm:$0xff] }
  0xff   :  { %232 = vst [vmem:[#allocation2 + $0x35] sm:$0xff] %v182_v40  ;;  %v2922_v44 = vpop.f32.mrb[4].mxu0 }
 0x100   :  { %v197_v45 = vadd.f32 %v2922_v44, %v2399_v29  ;;  %v191_v46 = vpop.f32.mrb[5].mxu0  ;;  %v2431_v44 = vld [vmem:[%s4802_s3 + $0x178] sm:$0xff] }
 0x101   :  { %v192_v48 = vadd.f32 %v2399_v29, %v191_v46  ;;  %v293_v60 = vld [vmem:[#allocation2 + $0x19] sm:$0xff]  ;;  %v294_v0 = vld [vmem:[#allocation2 + $0x21] sm:$0xff] }
 0x102   :  { %v290_v49 = vld [vmem:[#allocation2 + $0x1] sm:$0xff]  ;;  %v291_v51 = vld [vmem:[#allocation2 + $0x9] sm:$0xff]  ;;  %241 = vst [vmem:[#allocation2 + $0x7d] sm:$0xff] %v197_v45  ;;  %v253_v61 = vld [vmem:[#allocation2 + $0x18] sm:$0xff] }
 0x103   :  { %v250_v50 = vld [vmem:[#allocation2] sm:$0xff]  ;;  %2958 = vmatprep.mubr.f32.mxu0 %v290_v49  ;;  %v251_v53 = vld [vmem:[#allocation2 + $0x8] sm:$0xff]  ;;  %238 = vst [vmem:[#allocation2 + $0x65] sm:$0xff] %v192_v48  ;;  %v2925_v54 = vpop.f32.mrb[6].mxu0  ;;  %v304_v45 = vld [vmem:[#allocation2 + $0x71] sm:$0xff]  ;;  %v3662_v48 = vpack.c.bf16 %v2431_v44, %v2430_v43 }
 0x104   :  { %3026 = vmatprep.mubr.f32.mxu1 %v250_v50  ;;  %2959 = vmatmul.mubr.f32.vlgmr.msra.gmra.mrb[8].mxu0 %v291_v51  ;;  %v207_v57 = vadd.f32 %v2925_v54, %v2399_v29  ;;  %v201_v58 = vpop.f32.mrb[7].mxu0  ;;  %v254_v1 = vld [vmem:[#allocation2 + $0x20] sm:$0xff]  ;;  %v944_v50 = vld [vmem:[%s4805_s4 + $0x8] sm:$0xff] }
 0x105   :  { %3027 = vmatmul.mubr.f32.vlgmr.msra.gmra.mrb[0].mxu1 %v251_v53  ;;  %2961 = vmatprep.mubr.f32.mxu0 %v292_v47  ;;  %v202_v59 = vadd.f32 %v2399_v29, %v201_v58  ;;  %v299_v16 = vld [vmem:[#allocation2 + $0x49] sm:$0xff]  ;;  %v3654_v29 = vpack.c.bf16 %v2427_v15, %v2426_v14  ;;  %v300_v34 = vld [vmem:[#allocation2 + $0x51] sm:$0xff]  ;;  %v943_v49 = vld [vmem:[%s4805_s4] sm:$0xff] }
 0x106   :  { %3637 = vmatpush3.bf16.msra.mxu1 %v4180_v20  ;;  %3029 = vmatprep.mubr.f32.mxu1 %v3915_v3  ;;  %247 = vst [vmem:[#allocation2 + $0xad] sm:$0xff] %v207_v57  ;;  %v296_v5 = vld [vmem:[#allocation2 + $0x31] sm:$0xff]  ;;  %v297_v11 = vld [vmem:[#allocation2 + $0x39] sm:$0xff]  ;;  %v259_v20 = vld [vmem:[#allocation2 + $0x48] sm:$0xff]  ;;  %v3666_v53 = vpack.c.bf16 %v944_v50, %v943_v49 }
 0x107   :  { %3639 = vmatprep.subr.bf16.mxu1 %v3638_v52  ;;  %244 = vst [vmem:[#allocation2 + $0x95] sm:$0xff] %v202_v59  ;;  %v256_v6 = vld [vmem:[#allocation2 + $0x30] sm:$0xff]  ;;  %v257_v12 = vld [vmem:[#allocation2 + $0x38] sm:$0xff]  ;;  %v310_v59 = vld [vmem:[#allocation2 + $0xa1] sm:$0xff] }
 0x108   :  { %2962 = vmatmul.mubr.f32.gmra.mrb[10].mxu0 %v293_v60  ;;  %v260_v35 = vld [vmem:[#allocation2 + $0x50] sm:$0xff]  ;;  %v950_v14 = vld [vmem:[%s4805_s4 + $0x38] sm:$0xff]  ;;  %v689_v15 = vld [vmem:[#allocation2 + $0x22] sm:$0xff] }
 0x109   :  { %3030 = vmatmul.mubr.f32.gmra.mrb[2].mxu1 %v253_v61  ;;  %2964 = vmatprep.mubr.f32.mxu0 %v294_v0  ;;  %v305_v51 = vld [vmem:[#allocation2 + $0x79] sm:$0xff]  ;;  %v306_v54 = vld [vmem:[#allocation2 + $0x81] sm:$0xff]  ;;  %v686_v9 = vld [vmem:[#allocation2 + $0xa] sm:$0xff] }
 0x10a   :  { %3032 = vmatprep.mubr.f32.mxu1 %v254_v1  ;;  %3641 = vmatpush3.bf16.msra.mxu1 %v3638_v52  ;;  %v302_v39 = vld [vmem:[#allocation2 + $0x61] sm:$0xff]  ;;  %v303_v46 = vld [vmem:[#allocation2 + $0x69] sm:$0xff]  ;;  %v265_v52 = vld [vmem:[#allocation2 + $0x78] sm:$0xff] }
 0x10b   :  { %3643 = vmatprep.subr.bf16.mxu1 %v3642_v62  ;;  %v262_v40 = vld [vmem:[#allocation2 + $0x60] sm:$0xff]  ;;  %v263_v47 = vld [vmem:[#allocation2 + $0x68] sm:$0xff]  ;;  %v957_v49 = vld [vmem:[%s4805_s4 + $0x70] sm:$0xff] }
 0x10c   :  { %2965 = vmatmul.mubr.f32.gmra.mrb[12].mxu0 %v295_v4  ;;  %v266_v55 = vld [vmem:[#allocation2 + $0x80] sm:$0xff]  ;;  %v945_v4 = vld [vmem:[%s4805_s4 + $0x10] sm:$0xff]  ;;  %v958_v50 = vld [vmem:[%s4805_s4 + $0x78] sm:$0xff] }
 0x10d   :  { %3033 = vmatmul.mubr.f32.gmra.mrb[4].mxu1 %v3915_v3  ;;  %2967 = vmatprep.mubr.f32.mxu0 %v296_v5  ;;  %v271_v63 = vld [vmem:[#allocation2 + $0xa8] sm:$0xff]  ;;  %v312_v0 = vld [vmem:[#allocation2 + $0xb1] sm:$0xff]  ;;  %v955_v44 = vld [vmem:[%s4805_s4 + $0x60] sm:$0xff] }
 0x10e   :  { %3035 = vmatprep.mubr.f32.mxu1 %v256_v6  ;;  %3645 = vmatpush3.bf16.msra.mxu1 %v3642_v62  ;;  %v308_v57 = vld [vmem:[#allocation2 + $0x91] sm:$0xff]  ;;  %v309_v60 = vld [vmem:[#allocation2 + $0x99] sm:$0xff]  ;;  %v311_v62 = vld [vmem:[#allocation2 + $0xa9] sm:$0xff] }
 0x10f   :  { %3647 = vmatprep.subr.bf16.mxu1 %v3646_v7  ;;  %v268_v58 = vld [vmem:[#allocation2 + $0x90] sm:$0xff]  ;;  %v269_v61 = vld [vmem:[#allocation2 + $0x98] sm:$0xff]  ;;  %v685_v6 = vld [vmem:[#allocation2 + $0x2] sm:$0xff] }
 0x110   :  { %2968 = vmatmul.mubr.f32.gmra.mrb[14].mxu0 %v297_v11  ;;  %v272_v1 = vld [vmem:[#allocation2 + $0xb0] sm:$0xff]  ;;  %v946_v5 = vld [vmem:[%s4805_s4 + $0x18] sm:$0xff]  ;;  %v948_v11 = vld [vmem:[%s4805_s4 + $0x28] sm:$0xff] }
 0x111   :  { %3036 = vmatmul.mubr.f32.gmra.mrb[6].mxu1 %v257_v12  ;;  %2970 = vmatprep.mubr.f32.mxu0 %v298_v10  ;;  %v3670_v8 = vpack.c.bf16 %v946_v5, %v945_v4  ;;  %v947_v10 = vld [vmem:[%s4805_s4 + $0x20] sm:$0xff]  ;;  %v694_v43 = vld [vmem:[#allocation2 + $0x4a] sm:$0xff] }
 0x112   :  { %3038 = vmatprep.mubr.f32.mxu1 %v3915_v3  ;;  %3649 = vmatpush3.bf16.msra.mxu1 %v3646_v7  ;;  %v687_v7 = vld [vmem:[#allocation2 + $0x12] sm:$0xff]  ;;  %v3674_v12 = vpack.c.bf16 %v948_v11, %v947_v10  ;;  %v919_v4 = vld [vmem:[#allocation3] sm:$0xff]  ;;  %v2436_v10 = vld [vmem:[%s4805_s4 + $0xa0] sm:$0xff] }
 0x113   :  { %3651 = vmatprep.subr.bf16.mxu1 %v3650_v13  ;;  %v2434_v5 = vld [vmem:[%s4805_s4 + $0x90] sm:$0xff]  ;;  %v2437_v11 = vld [vmem:[%s4805_s4 + $0xa8] sm:$0xff] }
 0x114   :  { %2971 = vmatmul.mubr.f32.gmra.mrb[16].mxu0 %v299_v16  ;;  %v690_v16 = vld [vmem:[#allocation2 + $0x2a] sm:$0xff] }
 0x115   :  { %3039 = vmatmul.mubr.f32.gmra.mrb[8].mxu1 %v259_v20  ;;  %2973 = vmatprep.mubr.f32.mxu0 %v300_v34  ;;  %v952_v20 = vld [vmem:[%s4805_s4 + $0x48] sm:$0xff] }
 0x116   :  { %3041 = vmatprep.mubr.f32.mxu1 %v260_v35  ;;  %3653 = vmatpush3.bf16.msra.mxu1 %v3650_v13  ;;  %v688_v13 = vld [vmem:[#allocation2 + $0x1a] sm:$0xff]  ;;  %v693_v34 = vld [vmem:[#allocation2 + $0x42] sm:$0xff]  ;;  %v3682_v35 = vpack.c.bf16 %v952_v20, %v951_v18 }
 0x117   :  { %3655 = vmatprep.subr.bf16.mxu1 %v3654_v29  ;;  %v2440_v20 = vld [vmem:[%s4805_s4 + $0xc0] sm:$0xff] }
 0x118   :  { %2974 = vmatmul.mubr.f32.gmra.mrb[18].mxu0 %v301_v38  ;;  %v692_v38 = vld [vmem:[#allocation2 + $0x3a] sm:$0xff] }
 0x119   :  { %3042 = vmatmul.mubr.f32.gmra.mrb[10].mxu1 %v3915_v3  ;;  %2976 = vmatprep.mubr.f32.mxu0 %v302_v39  ;;  %v953_v39 = vld [vmem:[%s4805_s4 + $0x50] sm:$0xff] }
 0x11a   :  { %3044 = vmatprep.mubr.f32.mxu1 %v262_v40  ;;  %3657 = vmatpush3.bf16.msra.mxu1 %v3654_v29  ;;  %v691_v29 = vld [vmem:[#allocation2 + $0x32] sm:$0xff] }
 0x11b   :  { %3659 = vmatprep.subr.bf16.mxu1 %v3658_v42  ;;  %v954_v40 = vld [vmem:[%s4805_s4 + $0x58] sm:$0xff] }
 0x11c   :  { %2977 = vmatmul.mubr.f32.gmra.mrb[20].mxu0 %v303_v46  ;;  %v695_v46 = vld [vmem:[#allocation2 + $0x52] sm:$0xff] }
 0x11d   :  { %3045 = vmatmul.mubr.f32.gmra.mrb[12].mxu1 %v263_v47  ;;  %2979 = vmatprep.mubr.f32.mxu0 %v304_v45  ;;  %v956_v45 = vld [vmem:[%s4805_s4 + $0x68] sm:$0xff]  ;;  %v696_v47 = vld [vmem:[#allocation2 + $0x5a] sm:$0xff] }
 0x11e   :  { %3047 = vmatprep.mubr.f32.mxu1 %v3915_v3  ;;  %3661 = vmatpush3.bf16.msra.mxu1 %v3658_v42  ;;  %v3686_v42 = vpack.c.bf16 %v954_v40, %v953_v39  ;;  %v2442_v39 = vld [vmem:[%s4805_s4 + $0xd0] sm:$0xff]  ;;  %v2443_v40 = vld [vmem:[%s4805_s4 + $0xd8] sm:$0xff] }
 0x11f   :  { %3663 = vmatprep.subr.bf16.mxu1 %v3662_v48 }
 0x120   :  { %2980 = vmatmul.mubr.f32.gmra.mrb[22].mxu0 %v305_v51  ;;  %v697_v51 = vld [vmem:[#allocation2 + $0x62] sm:$0xff] }
 0x121   :  { %3048 = vmatmul.mubr.f32.gmra.mrb[14].mxu1 %v265_v52  ;;  %2982 = vmatprep.mubr.f32.mxu0 %v306_v54  ;;  %v699_v52 = vld [vmem:[#allocation2 + $0x72] sm:$0xff]  ;;  %v698_v54 = vld [vmem:[#allocation2 + $0x6a] sm:$0xff] }
 0x122   :  { %3050 = vmatprep.mubr.f32.mxu1 %v266_v55  ;;  %3665 = vmatpush3.bf16.msra.mxu1 %v3662_v48  ;;  %v3690_v48 = vpack.c.bf16 %v956_v45, %v955_v44  ;;  %v2432_v55 = vld [vmem:[%s4805_s4 + $0x80] sm:$0xff]  ;;  %v3718_v44 = vpack.c.bf16 %v2443_v40, %v2442_v39  ;;  %v1390_v39 = vld [vmem:[#allocation3 + $0x22] sm:$0xff] }
 0x123   :  { %3667 = vmatprep.subr.bf16.mxu1 %v3666_v53  ;;  %v2444_v45 = vld [vmem:[%s4805_s4 + $0xe0] sm:$0xff] }
 0x124   :  { %2983 = vmatmul.mubr.f32.gmra.mrb[24].mxu0 %v307_v56  ;;  %v2433_v56 = vld [vmem:[%s4805_s4 + $0x88] sm:$0xff]  ;;  %v1392_v40 = vld [vmem:[#allocation3 + $0x32] sm:$0xff] }
 0x125   :  { %3051 = vmatmul.mubr.f32.gmra.mrb[16].mxu1 %v3915_v3  ;;  %2985 = vmatprep.mubr.f32.mxu0 %v308_v57  ;;  %v3698_v57 = vpack.c.bf16 %v2433_v56, %v2432_v55  ;;  %v2448_v55 = vld [vmem:[%s4805_s4 + $0x100] sm:$0xff]  ;;  %v2449_v56 = vld [vmem:[%s4805_s4 + $0x108] sm:$0xff] }
 0x126   :  { %3053 = vmatprep.mubr.f32.mxu1 %v268_v58  ;;  %v700_v58 = vld [vmem:[#allocation2 + $0x7a] sm:$0xff] }
 0x128   :  { %2986 = vmatmul.mubr.f32.gmra.mrb[26].mxu0 %v309_v60  ;;  %v702_v60 = vld [vmem:[#allocation2 + $0x8a] sm:$0xff] }
 0x129   :  { %3054 = vmatmul.mubr.f32.gmra.mrb[18].mxu1 %v269_v61  ;;  %2988 = vmatprep.mubr.f32.mxu0 %v310_v59  ;;  %v701_v59 = vld [vmem:[#allocation2 + $0x82] sm:$0xff]  ;;  %v703_v61 = vld [vmem:[#allocation2 + $0x92] sm:$0xff] }
 0x12a   :  { %3056 = vmatprep.mubr.f32.mxu1 %v3915_v3 }
 0x12c   :  { %2989 = vmatmul.mubr.f32.gmra.mrb[28].mxu0 %v311_v62  ;;  %v705_v62 = vld [vmem:[#allocation2 + $0xa2] sm:$0xff] }
 0x12d   :  { %3057 = vmatmul.mubr.f32.gmra.mrb[20].mxu1 %v271_v63  ;;  %2991 = vmatprep.mubr.f32.mxu0 %v312_v0  ;;  %v704_v63 = vld [vmem:[#allocation2 + $0x9a] sm:$0xff]  ;;  %v706_v0 = vld [vmem:[#allocation2 + $0xaa] sm:$0xff] }
 0x12e   :  { %3059 = vmatprep.mubr.f32.mxu1 %v272_v1  ;;  %v707_v1 = vld [vmem:[#allocation2 + $0xb2] sm:$0xff] }
 0x130   :  { %2992 = vmatmul.mubr.f32.gmra.mrb[30].mxu0 %v313_v2  ;;  %v708_v2 = vld [vmem:[#allocation2 + $0xba] sm:$0xff] }
 0x131   :  { %3060 = vmatmul.mubr.f32.gmra.mrb[22].mxu1 %v3915_v3  ;;  %v949_v3 = vld [vmem:[%s4805_s4 + $0x30] sm:$0xff] }
 0x132   :  { %3094 = vmatprep.mubr.f32.mxu1 %v685_v6  ;;  %v3678_v17 = vpack.c.bf16 %v950_v14, %v949_v3  ;;  %v2435_v6 = vld [vmem:[%s4805_s4 + $0x98] sm:$0xff]  ;;  %v3706_v3 = vpack.c.bf16 %v2437_v11, %v2436_v10  ;;  %v2438_v14 = vld [vmem:[%s4805_s4 + $0xb0] sm:$0xff] }
 0x133   :  { %v2455_v11 = vld [vmem:[%s4805_s4 + $0x138] sm:$0xff] }
 0x135   :  { %3095 = vmatmul.mubr.f32.vlgmr.msra.gmra.mrb[0].mxu1 %v686_v9  ;;  %v3702_v9 = vpack.c.bf16 %v2435_v6, %v2434_v5  ;;  %v2451_v5 = vld [vmem:[%s4805_s4 + $0x118] sm:$0xff] }
 0x136   :  { %3669 = vmatpush3.bf16.msra.mxu1 %v3666_v53  ;;  %3097 = vmatprep.mubr.f32.mxu1 %v687_v7  ;;  %v3694_v53 = vpack.c.bf16 %v958_v50, %v957_v49  ;;  %v920_v7 = vld [vmem:[#allocation3 + $0x8] sm:$0xff]  ;;  %v1154_v6 = vld [vmem:[#allocation3 + $0x11] sm:$0xff] }
 0x137   :  { %3671 = vmatprep.subr.bf16.mxu1 %v3670_v8  ;;  %v2446_v50 = vld [vmem:[%s4805_s4 + $0xf0] sm:$0xff] }
 0x139   :  { %3098 = vmatmul.mubr.f32.gmra.mrb[24].mxu1 %v688_v13  ;;  %v923_v13 = vld [vmem:[#allocation3 + $0x20] sm:$0xff] }
 0x13a   :  { %3100 = vmatprep.mubr.f32.mxu1 %v689_v15  ;;  %3673 = vmatpush3.bf16.msra.mxu1 %v3670_v8  ;;  %v921_v8 = vld [vmem:[#allocation3 + $0x10] sm:$0xff] }
 0x13b   :  { %3675 = vmatprep.subr.bf16.mxu1 %v3674_v12  ;;  %v2439_v15 = vld [vmem:[%s4805_s4 + $0xb8] sm:$0xff] }
 0x13c   :  { %v3710_v18 = vpack.c.bf16 %v2439_v15, %v2438_v14  ;;  %v1160_v14 = vld [vmem:[#allocation3 + $0x41] sm:$0xff]  ;;  %v2459_v15 = vld [vmem:[%s4805_s4 + $0x158] sm:$0xff] }
 0x13d   :  { %3101 = vmatmul.mubr.f32.gmra.mrb[26].mxu1 %v690_v16  ;;  %v924_v16 = vld [vmem:[#allocation3 + $0x28] sm:$0xff] }
 0x13e   :  { %3103 = vmatprep.mubr.f32.mxu1 %v691_v29  ;;  %3677 = vmatpush3.bf16.msra.mxu1 %v3674_v12  ;;  %v922_v12 = vld [vmem:[#allocation3 + $0x18] sm:$0xff]  ;;  %v2441_v29 = vld [vmem:[%s4805_s4 + $0xc8] sm:$0xff] }
 0x13f   :  { %3679 = vmatprep.subr.bf16.mxu1 %v3678_v17 }
 0x141   :  { %3104 = vmatmul.mubr.f32.gmra.mrb[6].mxu1 %v692_v38  ;;  %v3714_v38 = vpack.c.bf16 %v2441_v29, %v2440_v20  ;;  %v2462_v20 = vld [vmem:[%s4805_s4 + $0x170] sm:$0xff]  ;;  %v2463_v29 = vld [vmem:[%s4805_s4 + $0x178] sm:$0xff] }
 0x142   :  { %3106 = vmatprep.mubr.f32.mxu1 %v693_v34  ;;  %3681 = vmatpush3.bf16.msra.mxu1 %v3678_v17  ;;  %v925_v17 = vld [vmem:[#allocation3 + $0x30] sm:$0xff]  ;;  %v926_v34 = vld [vmem:[#allocation3 + $0x38] sm:$0xff] }
 0x143   :  { %3683 = vmatprep.subr.bf16.mxu1 %v3682_v35 }
 0x145   :  { %3107 = vmatmul.mubr.f32.gmra.mrb[28].mxu1 %v694_v43  ;;  %v929_v43 = vld [vmem:[#allocation3 + $0x50] sm:$0xff] }
 0x146   :  { %3109 = vmatprep.mubr.f32.mxu1 %v695_v46  ;;  %3685 = vmatpush3.bf16.msra.mxu1 %v3682_v35  ;;  %v927_v35 = vld [vmem:[#allocation3 + $0x40] sm:$0xff] }
 0x147   :  { %3687 = vmatprep.subr.bf16.mxu1 %v3686_v42  ;;  %v2445_v46 = vld [vmem:[%s4805_s4 + $0xe8] sm:$0xff] }
 0x148   :  { %v3722_v49 = vpack.c.bf16 %v2445_v46, %v2444_v45 }
 0x149   :  { %3110 = vmatmul.mubr.f32.gmra.mrb[30].mxu1 %v696_v47  ;;  %v930_v47 = vld [vmem:[#allocation3 + $0x58] sm:$0xff] }
 0x14a   :  { %3112 = vmatprep.mubr.f32.mxu1 %v697_v51  ;;  %3689 = vmatpush3.bf16.msra.mxu1 %v3686_v42  ;;  %v928_v42 = vld [vmem:[#allocation3 + $0x48] sm:$0xff]  ;;  %v2447_v51 = vld [vmem:[%s4805_s4 + $0xf8] sm:$0xff] }
 0x14b   :  { %3691 = vmatprep.subr.bf16.mxu1 %v3690_v48 }
 0x14d   :  { %3113 = vmatmul.mubr.f32.gmra.mrb[12].mxu1 %v698_v54  ;;  %v3726_v54 = vpack.c.bf16 %v2447_v51, %v2446_v50 }
 0x14e   :  { %3115 = vmatprep.mubr.f32.mxu1 %v699_v52  ;;  %3693 = vmatpush3.bf16.msra.mxu1 %v3690_v48  ;;  %v931_v48 = vld [vmem:[#allocation3 + $0x60] sm:$0xff]  ;;  %v932_v52 = vld [vmem:[#allocation3 + $0x68] sm:$0xff] }
 0x14f   :  { %3695 = vmatprep.subr.bf16.mxu1 %v3694_v53 }
 0x151   :  { %3116 = vmatmul.mubr.f32.gmra.mrb[32].mxu1 %v700_v58  ;;  %v935_v58 = vld [vmem:[#allocation3 + $0x80] sm:$0xff] }
 0x152   :  { %3118 = vmatprep.mubr.f32.mxu1 %v701_v59  ;;  %3697 = vmatpush3.bf16.msra.mxu1 %v3694_v53  ;;  %v933_v53 = vld [vmem:[#allocation3 + $0x70] sm:$0xff]  ;;  %v3730_v59 = vpack.c.bf16 %v2449_v56, %v2448_v55  ;;  %v1402_v55 = vld [vmem:[#allocation3 + $0x82] sm:$0xff] }
 0x153   :  { %3699 = vmatprep.subr.bf16.mxu1 %v3698_v57 }
 0x155   :  { %3119 = vmatmul.mubr.f32.gmra.mrb[34].mxu1 %v702_v60  ;;  %v936_v60 = vld [vmem:[#allocation3 + $0x88] sm:$0xff] }
 0x156   :  { %3121 = vmatprep.mubr.f32.mxu1 %v703_v61  ;;  %v937_v61 = vld [vmem:[#allocation3 + $0x90] sm:$0xff] }
 0x159   :  { %3122 = vmatmul.mubr.f32.gmra.mrb[18].mxu1 %v704_v63  ;;  %v939_v63 = vld [vmem:[#allocation3 + $0xa0] sm:$0xff] }
 0x15a   :  { %3124 = vmatprep.mubr.f32.mxu1 %v705_v62  ;;  %v938_v62 = vld [vmem:[#allocation3 + $0x98] sm:$0xff] }
 0x15d   :  { %3125 = vmatmul.mubr.f32.gmra.mrb[36].mxu1 %v706_v0  ;;  %v940_v0 = vld [vmem:[#allocation3 + $0xa8] sm:$0xff] }
 0x15e   :  { %3127 = vmatprep.mubr.f32.mxu1 %v707_v1  ;;  %v941_v1 = vld [vmem:[#allocation3 + $0xb0] sm:$0xff] }
 0x161   :  { %3128 = vmatmul.mubr.f32.gmra.mrb[38].mxu1 %v708_v2  ;;  %v942_v2 = vld [vmem:[#allocation3 + $0xb8] sm:$0xff] }
 0x162   :  { %3162 = vmatprep.mubr.f32.mxu1 %v919_v4  ;;  %v2450_v4 = vld [vmem:[%s4805_s4 + $0x110] sm:$0xff] }
 0x165   :  { %3163 = vmatmul.mubr.f32.vlgmr.msra.gmra.mrb[0].mxu1 %v920_v7  ;;  %v3734_v7 = vpack.c.bf16 %v2451_v5, %v2450_v4 }
 0x166   :  { %3701 = vmatpush3.bf16.msra.mxu1 %v3698_v57  ;;  %3165 = vmatprep.mubr.f32.mxu1 %v921_v8  ;;  %v934_v57 = vld [vmem:[#allocation3 + $0x78] sm:$0xff] }
 0x167   :  { %3703 = vmatprep.subr.bf16.mxu1 %v3702_v9  ;;  %v2452_v8 = vld [vmem:[%s4805_s4 + $0x120] sm:$0xff] }
 0x169   :  { %3166 = vmatmul.mubr.f32.gmra.mrb[40].mxu1 %v922_v12  ;;  %v1157_v12 = vld [vmem:[#allocation3 + $0x29] sm:$0xff] }
 0x16a   :  { %3705 = vmatpush3.bf16.msra.mxu1 %v3702_v9  ;;  %3168 = vmatprep.mubr.f32.mxu1 %v923_v13  ;;  %v2453_v9 = vld [vmem:[%s4805_s4 + $0x128] sm:$0xff]  ;;  %v2456_v13 = vld [vmem:[%s4805_s4 + $0x140] sm:$0xff] }
 0x16b   :  { %3707 = vmatprep.subr.bf16.mxu1 %v3706_v3  ;;  %v3738_v10 = vpack.c.bf16 %v2453_v9, %v2452_v8  ;;  %v1407_v9 = vld [vmem:[#allocation3 + $0xaa] sm:$0xff] }
 0x16d   :  { %3169 = vmatmul.mubr.f32.gmra.mrb[42].mxu1 %v924_v16 }
 0x16e   :  { %3171 = vmatprep.mubr.f32.mxu1 %v925_v17  ;;  %3709 = vmatpush3.bf16.msra.mxu1 %v3706_v3  ;;  %v2457_v3 = vld [vmem:[%s4805_s4 + $0x148] sm:$0xff] }
 0x16f   :  { %3711 = vmatprep.subr.bf16.mxu1 %v3710_v18  ;;  %v2461_v17 = vld [vmem:[%s4805_s4 + $0x168] sm:$0xff] }
 0x171   :  { %3172 = vmatmul.mubr.f32.gmra.mrb[6].mxu1 %v926_v34  ;;  %v1166_v34 = vld [vmem:[#allocation3 + $0x71] sm:$0xff] }
 0x172   :  { %3174 = vmatprep.mubr.f32.mxu1 %v927_v35  ;;  %3713 = vmatpush3.bf16.msra.mxu1 %v3710_v18  ;;  %v1163_v18 = vld [vmem:[#allocation3 + $0x59] sm:$0xff]  ;;  %v1172_v35 = vld [vmem:[#allocation3 + $0xa1] sm:$0xff] }
 0x173   :  { %3715 = vmatprep.subr.bf16.mxu1 %v3714_v38 }
 0x175   :  { %3175 = vmatmul.mubr.f32.gmra.mrb[44].mxu1 %v928_v42  ;;  %v1396_v42 = vld [vmem:[#allocation3 + $0x52] sm:$0xff] }
 0x176   :  { %3177 = vmatprep.mubr.f32.mxu1 %v929_v43  ;;  %3717 = vmatpush3.bf16.msra.mxu1 %v3714_v38  ;;  %v1388_v38 = vld [vmem:[#allocation3 + $0x12] sm:$0xff]  ;;  %v1397_v43 = vld [vmem:[#allocation3 + $0x5a] sm:$0xff] }
 0x177   :  { %3719 = vmatprep.subr.bf16.mxu1 %v3718_v44 }
 0x179   :  { %3178 = vmatmul.mubr.f32.gmra.mrb[46].mxu1 %v930_v47  ;;  %v1399_v47 = vld [vmem:[#allocation3 + $0x6a] sm:$0xff] }
 0x17a   :  { %3180 = vmatprep.mubr.f32.mxu1 %v931_v48  ;;  %3721 = vmatpush3.bf16.msra.mxu1 %v3718_v44  ;;  %v1398_v44 = vld [vmem:[#allocation3 + $0x62] sm:$0xff]  ;;  %v1400_v48 = vld [vmem:[#allocation3 + $0x72] sm:$0xff] }
 0x17b   :  { %3723 = vmatprep.subr.bf16.mxu1 %v3722_v49 }
 0x17d   :  { %3181 = vmatmul.mubr.f32.gmra.mrb[12].mxu1 %v932_v52 }
 0x17e   :  { %3183 = vmatprep.mubr.f32.mxu1 %v933_v53  ;;  %3725 = vmatpush3.bf16.msra.mxu1 %v3722_v49 }
 0x17f   :  { %3727 = vmatprep.subr.bf16.mxu1 %v3726_v54 }
 0x181   :  { %3184 = vmatmul.mubr.f32.gmra.mrb[48].mxu1 %v934_v57 }
 0x182   :  { %3186 = vmatprep.mubr.f32.mxu1 %v935_v58  ;;  %3729 = vmatpush3.bf16.msra.mxu1 %v3726_v54  ;;  %v1401_v54 = vld [vmem:[#allocation3 + $0x7a] sm:$0xff] }
 0x183   :  { %3731 = vmatprep.subr.bf16.mxu1 %v3730_v59 }
 0x185   :  { %3187 = vmatmul.mubr.f32.gmra.mrb[50].mxu1 %v936_v60 }
 0x186   :  { %3189 = vmatprep.mubr.f32.mxu1 %v937_v61  ;;  %v1403_v61 = vld [vmem:[#allocation3 + $0x8a] sm:$0xff] }
 0x189   :  { %3190 = vmatmul.mubr.f32.gmra.mrb[18].mxu1 %v938_v62  ;;  %v1404_v62 = vld [vmem:[#allocation3 + $0x92] sm:$0xff] }
 0x18a   :  { %3192 = vmatprep.mubr.f32.mxu1 %v939_v63 }
 0x18d   :  { %3193 = vmatmul.mubr.f32.gmra.mrb[52].mxu1 %v940_v0 }
 0x18e   :  { %3195 = vmatprep.mubr.f32.mxu1 %v941_v1  ;;  %v1405_v1 = vld [vmem:[#allocation3 + $0x9a] sm:$0xff] }
 0x191   :  { %3196 = vmatmul.mubr.f32.gmra.mrb[54].mxu1 %v942_v2  ;;  %v1406_v2 = vld [vmem:[#allocation3 + $0xa2] sm:$0xff] }
 0x192   :  { %3230 = vmatprep.mubr.f32.mxu1 %v4186_v21  ;;  %v2454_v21 = vld [vmem:[%s4805_s4 + $0x130] sm:$0xff] }
 0x195   :  { %3231 = vmatmul.mubr.f32.vlgmr.msra.gmra.mrb[0].mxu1 %v4191_v22  ;;  %v3742_v22 = vpack.c.bf16 %v2455_v11, %v2454_v21 }
 0x196   :  { %3733 = vmatpush3.bf16.msra.mxu1 %v3730_v59  ;;  %3233 = vmatprep.mubr.f32.mxu1 %v1154_v6 }
 0x197   :  { %3735 = vmatprep.subr.bf16.mxu1 %v3734_v7 }
 0x199   :  { %3234 = vmatmul.mubr.f32.gmra.mrb[56].mxu1 %v4198_v23  ;;  %v3746_v23 = vpack.c.bf16 %v2457_v3, %v2456_v13  ;;  %v1409_v3 = vld [vmem:[#allocation3 + $0xba] sm:$0xff] }
 0x19a   :  { %3737 = vmatpush3.bf16.msra.mxu1 %v3734_v7  ;;  %3236 = vmatprep.mubr.f32.mxu1 %v4204_v24  ;;  %v2458_v24 = vld [vmem:[%s4805_s4 + $0x150] sm:$0xff] }
 0x19b   :  { %3739 = vmatprep.subr.bf16.mxu1 %v3738_v10  ;;  %v3750_v16 = vpack.c.bf16 %v2459_v15, %v2458_v24 }
 0x19d   :  { %3237 = vmatmul.mubr.f32.gmra.mrb[58].mxu1 %v1157_v12 }
 0x19e   :  { %3239 = vmatprep.mubr.f32.mxu1 %v4210_v25  ;;  %3741 = vmatpush3.bf16.msra.mxu1 %v3738_v10  ;;  %v2460_v25 = vld [vmem:[%s4805_s4 + $0x160] sm:$0xff] }
 0x19f   :  { %3743 = vmatprep.subr.bf16.mxu1 %v3742_v22  ;;  %v1408_v10 = vld [vmem:[#allocation3 + $0xb2] sm:$0xff] }
 0x1a1   :  { %3240 = vmatmul.mubr.f32.gmra.mrb[6].mxu1 %v4216_v26  ;;  %v3754_v26 = vpack.c.bf16 %v2461_v17, %v2460_v25 }
 0x1a2   :  { %3242 = vmatprep.mubr.f32.mxu1 %v1160_v14  ;;  %3745 = vmatpush3.bf16.msra.mxu1 %v3742_v22 }
 0x1a3   :  { %3747 = vmatprep.subr.bf16.mxu1 %v3746_v23 }
 0x1a5   :  { %3243 = vmatmul.mubr.f32.gmra.mrb[60].mxu1 %v4222_v27  ;;  %v3758_v27 = vpack.c.bf16 %v2463_v29, %v2462_v20 }
 0x1a6   :  { %3245 = vmatprep.mubr.f32.mxu1 %v4228_v28  ;;  %3749 = vmatpush3.bf16.msra.mxu1 %v3746_v23  ;;  %v1169_v28 = vld [vmem:[#allocation3 + $0x89] sm:$0xff] }
 0x1a7   :  { %3751 = vmatprep.subr.bf16.mxu1 %v3750_v16 }
 0x1a9   :  { %3246 = vmatmul.mubr.f32.gmra.mrb[62].mxu1 %v1163_v18 }
 0x1aa   :  { %3248 = vmatprep.mubr.f32.mxu1 %v4237_v30  ;;  %3753 = vmatpush3.bf16.msra.mxu1 %v3750_v16  ;;  %v1175_v30 = vld [vmem:[#allocation3 + $0xb9] sm:$0xff] }
 0x1ab   :  { %3755 = vmatprep.subr.bf16.mxu1 %v3754_v26 }
 0x1ad   :  { %3249 = vmatmul.mubr.f32.gmra.mrb[12].mxu1 %v4243_v31  ;;  %v1386_v31 = vld [vmem:[#allocation3 + $0x2] sm:$0xff] }
 0x1ae   :  { %3251 = vmatprep.mubr.f32.mxu1 %v1166_v34  ;;  %3757 = vmatpush3.bf16.msra.mxu1 %v3754_v26 }
 0x1af   :  { %3759 = vmatprep.subr.bf16.mxu1 %v3758_v27 }
 0x1b1   :  { %3252 = vmatmul.mubr.f32.gmra.mrb[64].mxu1 %v4249_v36  ;;  %v1387_v36 = vld [vmem:[#allocation3 + $0xa] sm:$0xff] }
 0x1b2   :  { %3254 = vmatprep.mubr.f32.mxu1 %v4255_v41  ;;  %3761 = vmatpush3.bf16.msra.mxu1 %v3758_v27  ;;  %v1389_v41 = vld [vmem:[#allocation3 + $0x1a] sm:$0xff] }
 0x1b3   :  { %v2465_v27 = vld [vmem:[%s4806_s5 + $0x80] sm:$0xff] }
 0x1b5   :  { %3255 = vmatmul.mubr.f32.gmra.mrb[66].mxu1 %v1169_v28  ;;  %v2466_v28 = vld [vmem:[%s4806_s5 + $0x88] sm:$0xff] }
 0x1b6   :  { %3257 = vmatprep.mubr.f32.mxu1 %v4301_v19  ;;  %v1391_v19 = vld [vmem:[#allocation3 + $0x2a] sm:$0xff] }
 0x1b9   :  { %3258 = vmatmul.mubr.f32.gmra.mrb[18].mxu1 %v4307_v32  ;;  %v1393_v32 = vld [vmem:[#allocation3 + $0x3a] sm:$0xff] }
 0x1ba   :  { %3260 = vmatprep.mubr.f32.mxu1 %v1172_v35  ;;  %v3762_v35 = vpack.c.bf16 %v2466_v28, %v2465_v27  ;;  %v1698_v27 = vld [vmem:[%s4806_s5 + $0x8] sm:$0xff] }
 0x1bc   :  { %3763 = vmatprep.subr.bf16.mxu0 %v3762_v35 }
 0x1bd   :  { %3261 = vmatmul.mubr.f32.gmra.mrb[68].mxu1 %v4312_v33  ;;  %v1394_v33 = vld [vmem:[#allocation3 + $0x42] sm:$0xff]  ;;  %3765 = vmatpush3.bf16.msra.mxu0 %v3762_v35 }
 0x1be   :  { %3263 = vmatprep.mubr.f32.mxu1 %v4319_v37  ;;  %v1395_v37 = vld [vmem:[#allocation3 + $0x4a] sm:$0xff] }
 0x1c1   :  { %3264 = vmatmul.mubr.f32.gmra.mrb[70].mxu1 %v1175_v30 }
 0x1c2   :  { %3298 = vmatprep.mubr.f32.mxu1 %v1386_v31 }
 0x1c5   :  { %3299 = vmatmul.mubr.f32.vlgmr.msra.gmra.mrb[0].mxu1 %v1387_v36  ;;  %v2467_v36 = vld [vmem:[%s4806_s5 + $0x90] sm:$0xff] }
 0x1c6   :  { %3301 = vmatprep.mubr.f32.mxu1 %v1388_v38  ;;  %v2468_v38 = vld [vmem:[%s4806_s5 + $0x98] sm:$0xff] }
 0x1c9   :  { %3302 = vmatmul.mubr.f32.gmra.mrb[72].mxu1 %v1389_v41  ;;  %v3766_v41 = vpack.c.bf16 %v2468_v38, %v2467_v36 }
 0x1ca   :  { %3304 = vmatprep.mubr.f32.mxu1 %v1390_v39 }
 0x1cb   :  { %3767 = vmatprep.subr.bf16.mxu0 %v3766_v41 }
 0x1cc   :  { %3769 = vmatpush3.bf16.msra.mxu0 %v3766_v41 }
 0x1cd   :  { %3305 = vmatmul.mubr.f32.gmra.mrb[74].mxu1 %v1391_v19 }
 0x1ce   :  { %3307 = vmatprep.mubr.f32.mxu1 %v1392_v40 }
 0x1d1   :  { %3308 = vmatmul.mubr.f32.gmra.mrb[6].mxu1 %v1393_v32 }
 0x1d2   :  { %3310 = vmatprep.mubr.f32.mxu1 %v1394_v33 }
 0x1d5   :  { %3311 = vmatmul.mubr.f32.gmra.mrb[76].mxu1 %v1395_v37 }
 0x1d6   :  { %3313 = vmatprep.mubr.f32.mxu1 %v1396_v42 }
 0x1d7   :  { %v4493_v45 = vpop.f32.mrb[8].mxu0 }
 0x1d8   :  { %v4495_v46 = vpop.f32.mrb[9].mxu0 }
 0x1d9   :  { %3314 = vmatmul.mubr.f32.gmra.mrb[78].mxu1 %v1397_v43 }
 0x1da   :  { %3316 = vmatprep.mubr.f32.mxu1 %v1398_v44 }
 0x1db   :  { %v2963_v49 = vpop.f32.mrb[10].mxu0 }
 0x1dc   :  { %v3031_v50 = vpop.f32.mrb[2].mxu1  ;;  %v407_v52 = vpop.f32.mrb[11].mxu0 }
 0x1dd   :  { %v4497_v51 = vadd.f32 %v3031_v50, %v2963_v49  ;;  %v584_v53 = vpop.f32.mrb[3].mxu1  ;;  %3317 = vmatmul.mubr.f32.gmra.mrb[12].mxu1 %v1399_v47  ;;  %v2469_v47 = vld [vmem:[%s4806_s5 + $0xa0] sm:$0xff]  ;;  %v2471_v52 = vld [vmem:[%s4806_s5 + $0xb0] sm:$0xff] }
 0x1de   :  { %3319 = vmatprep.mubr.f32.mxu1 %v1400_v48  ;;  %v2470_v48 = vld [vmem:[%s4806_s5 + $0xa8] sm:$0xff]  ;;  %v2472_v53 = vld [vmem:[%s4806_s5 + $0xb8] sm:$0xff] }
 0x1df   :  { %v2966_v56 = vpop.f32.mrb[12].mxu0  ;;  %v3770_v50 = vpack.c.bf16 %v2470_v48, %v2469_v47 }
 0x1e0   :  { %v3034_v57 = vpop.f32.mrb[4].mxu1  ;;  %v416_v58 = vpop.f32.mrb[13].mxu0 }
 0x1e1   :  { %v593_v59 = vpop.f32.mrb[5].mxu1  ;;  %3320 = vmatmul.mubr.f32.gmra.mrb[80].mxu1 %v1401_v54  ;;  %3771 = vmatprep.subr.bf16.mxu0 %v3770_v50  ;;  %v3774_v54 = vpack.c.bf16 %v2472_v53, %v2471_v52 }
 0x1e2   :  { %v4499_v60 = vadd.f32 %v593_v59, %v416_v58  ;;  %3322 = vmatprep.mubr.f32.mxu1 %v1402_v55  ;;  %3773 = vmatpush3.bf16.msra.mxu0 %v3770_v50 }
 0x1e3   :  { %v4501_v63 = vpop.f32.mrb[14].mxu0  ;;  %3775 = vmatprep.subr.bf16.mxu0 %v3774_v54 }
 0x1e4   :  { %v4503_v0 = vpop.f32.mrb[15].mxu0 }
 0x1e5   :  { %3323 = vmatmul.mubr.f32.gmra.mrb[82].mxu1 %v1403_v61  ;;  %v2473_v61 = vld [vmem:[%s4806_s5 + $0xc0] sm:$0xff] }
 0x1e6   :  { %3325 = vmatprep.mubr.f32.mxu1 %v1404_v62  ;;  %3777 = vmatpush3.bf16.msra.mxu0 %v3774_v54  ;;  %v2474_v62 = vld [vmem:[%s4806_s5 + $0xc8] sm:$0xff] }
 0x1e7   :  { %v2972_v4 = vpop.f32.mrb[16].mxu0 }
 0x1e8   :  { %v3040_v5 = vpop.f32.mrb[8].mxu1  ;;  %v435_v7 = vpop.f32.mrb[17].mxu0 }
 0x1e9   :  { %v4505_v6 = vadd.f32 %v3040_v5, %v2972_v4  ;;  %v612_v8 = vpop.f32.mrb[9].mxu1  ;;  %3326 = vmatmul.mubr.f32.gmra.mrb[18].mxu1 %v1405_v1  ;;  %v2476_v4 = vld [vmem:[%s4806_s5 + $0xd8] sm:$0xff] }
 0x1ea   :  { %3328 = vmatprep.mubr.f32.mxu1 %v1406_v2  ;;  %v3778_v2 = vpack.c.bf16 %v2474_v62, %v2473_v61 }
 0x1eb   :  { %v2975_v21 = vpop.f32.mrb[18].mxu0 }
 0x1ec   :  { %v3043_v11 = vpop.f32.mrb[10].mxu1  ;;  %v444_v12 = vpop.f32.mrb[19].mxu0  ;;  %3779 = vmatprep.subr.bf16.mxu0 %v3778_v2 }
 0x1ed   :  { %v621_v22 = vpop.f32.mrb[11].mxu1  ;;  %3329 = vmatmul.mubr.f32.gmra.mrb[84].mxu1 %v1407_v9  ;;  %3781 = vmatpush3.bf16.msra.mxu0 %v3778_v2 }
 0x1ee   :  { %v4507_v13 = vadd.f32 %v621_v22, %v444_v12  ;;  %3331 = vmatprep.mubr.f32.mxu1 %v1408_v10  ;;  %v2478_v10 = vld [vmem:[%s4806_s5 + $0xe8] sm:$0xff]  ;;  %v2479_v22 = vld [vmem:[%s4806_s5 + $0xf0] sm:$0xff] }
 0x1ef   :  { %v4509_v14 = vpop.f32.mrb[20].mxu0 }
 0x1f0   :  { %v4511_v23 = vpop.f32.mrb[21].mxu0 }
 0x1f1   :  { %3332 = vmatmul.mubr.f32.gmra.mrb[86].mxu1 %v1409_v3 }
 0x1f3   :  { %v2981_v24 = vpop.f32.mrb[22].mxu0 }
 0x1f4   :  { %v3049_v15 = vpop.f32.mrb[14].mxu1  ;;  %v463_v25 = vpop.f32.mrb[23].mxu0 }
 0x1f5   :  { %v4513_v16 = vadd.f32 %v3049_v15, %v2981_v24  ;;  %v640_v17 = vpop.f32.mrb[15].mxu1 }
 0x1f7   :  { %v2984_v18 = vpop.f32.mrb[24].mxu0 }
 0x1f8   :  { %v3052_v26 = vpop.f32.mrb[16].mxu1  ;;  %v472_v20 = vpop.f32.mrb[25].mxu0 }
 0x1f9   :  { %v649_v29 = vpop.f32.mrb[17].mxu1 }
 0x1fa   :  { %v4515_v34 = vadd.f32 %v649_v29, %v472_v20  ;;  %v1697_v29 = vld [vmem:[%s4806_s5] sm:$0xff] }
 0x1fb   :  { %v4523_v30 = vpop.f32.mrb[26].mxu0  ;;  %v4581_v28 = vpack.c.bf16 %v1698_v27, %v1697_v29  ;;  %v4599_v27 = vld [vmem:[%s4804_s6 + $0x1] ss:$0 sm:$0xff] }
 0x1fc   :  { %v4525_v31 = vpop.f32.mrb[27].mxu0 }
 0x1ff   :  { %v2990_v39 = vpop.f32.mrb[28].mxu0 }
 0x200   :  { %v3058_v19 = vpop.f32.mrb[20].mxu1  ;;  %v491_v32 = vpop.f32.mrb[29].mxu0 }
 0x201   :  { %v673_v40 = vadd.f32 %v3058_v19, %v2990_v39  ;;  %v668_v33 = vpop.f32.mrb[21].mxu1 }
 0x203   :  { %v2993_v37 = vpop.f32.mrb[30].mxu0 }
 0x204   :  { %v3061_v42 = vpop.f32.mrb[22].mxu1  ;;  %v500_v43 = vpop.f32.mrb[31].mxu0 }
 0x205   :  { %v677_v44 = vpop.f32.mrb[23].mxu1 }
 0x206   :  { %v678_v49 = vadd.f32 %v677_v44, %v500_v43 }
 0x20c   :  { %v3099_v55 = vpop.f32.mrb[24].mxu1 }
 0x20d   :  { %v905_v56 = vadd.f32 %v3099_v55, %v4497_v51  ;;  %v802_v57 = vpop.f32.mrb[25].mxu1  ;;  %v2475_v51 = vld [vmem:[%s4806_s5 + $0xd0] sm:$0xff] }
 0x20e   :  { %v3782_v5 = vpack.c.bf16 %v2476_v4, %v2475_v51 }
 0x210   :  { %v3102_v58 = vpop.f32.mrb[26].mxu1  ;;  %3783 = vmatprep.subr.bf16.mxu0 %v3782_v5 }
 0x211   :  { %v811_v59 = vpop.f32.mrb[27].mxu1  ;;  %3785 = vmatpush3.bf16.msra.mxu0 %v3782_v5 }
 0x212   :  { %v906_v1 = vadd.f32 %v811_v59, %v4499_v60  ;;  %v2477_v60 = vld [vmem:[%s4806_s5 + $0xe0] sm:$0xff] }
 0x213   :  { %v3786_v21 = vpack.c.bf16 %v2478_v10, %v2477_v60 }
 0x215   :  { %3787 = vmatprep.subr.bf16.mxu0 %v3786_v21 }
 0x216   :  { %3789 = vmatpush3.bf16.msra.mxu0 %v3786_v21 }
 0x218   :  { %v3108_v7 = vpop.f32.mrb[28].mxu1 }
 0x219   :  { %v909_v8 = vadd.f32 %v3108_v7, %v4505_v6  ;;  %v830_v9 = vpop.f32.mrb[29].mxu1  ;;  %v2480_v6 = vld [vmem:[%s4806_s5 + $0xf8] sm:$0xff] }
 0x21a   :  { %v3790_v24 = vpack.c.bf16 %v2480_v6, %v2479_v22 }
 0x21c   :  { %v3111_v11 = vpop.f32.mrb[30].mxu1  ;;  %3791 = vmatprep.subr.bf16.mxu0 %v3790_v24 }
 0x21d   :  { %v839_v12 = vpop.f32.mrb[31].mxu1  ;;  %3793 = vmatpush3.bf16.msra.mxu0 %v3790_v24 }
 0x21e   :  { %v910_v3 = vadd.f32 %v839_v12, %v4507_v13  ;;  %3795 = vmatprep.subr.bf16.mxu0 %v4581_v28 }
 0x224   :  { %v3117_v15 = vpop.f32.mrb[32].mxu1 }
 0x225   :  { %v913_v25 = vadd.f32 %v3117_v15, %v4513_v16  ;;  %v858_v17 = vpop.f32.mrb[33].mxu1 }
 0x228   :  { %v3120_v18 = vpop.f32.mrb[34].mxu1 }
 0x229   :  { %v867_v26 = vpop.f32.mrb[35].mxu1 }
 0x22a   :  { %v914_v20 = vadd.f32 %v867_v26, %v4515_v34 }
 0x230   :  { %v3126_v13 = vpop.f32.mrb[36].mxu1 }
 0x231   :  { %v917_v35 = vadd.f32 %v3126_v13, %v673_v40  ;;  %v886_v36 = vpop.f32.mrb[37].mxu1 }
 0x234   :  { %v3129_v16 = vpop.f32.mrb[38].mxu1 }
 0x235   :  { %v895_v38 = vpop.f32.mrb[39].mxu1 }
 0x236   :  { %v918_v41 = vadd.f32 %v895_v38, %v678_v49 }
 0x23c   :  { %v3167_v39 = vpop.f32.mrb[40].mxu1 }
 0x23d   :  { %v1138_v34 = vadd.f32 %v3167_v39, %v905_v56  ;;  %v1035_v19 = vpop.f32.mrb[41].mxu1 }
 0x23e   :  { %v1700_v19 = vld [vmem:[%s4806_s5 + $0x18] sm:$0xff] }
 0x240   :  { %v3170_v32 = vpop.f32.mrb[42].mxu1 }
 0x241   :  { %v1044_v33 = vpop.f32.mrb[43].mxu1 }
 0x242   :  { %v1139_v37 = vadd.f32 %v1044_v33, %v906_v1 }
 0x248   :  { %v3176_v42 = vpop.f32.mrb[44].mxu1 }
 0x249   :  { %v1142_v43 = vadd.f32 %v3176_v42, %v909_v8  ;;  %v1063_v44 = vpop.f32.mrb[45].mxu1  ;;  %v1715_v42 = vld [vmem:[#allocation2 + $0x11] sm:$0xff] }
 0x24c   :  { %v3179_v47 = vpop.f32.mrb[46].mxu1 }
 0x24d   :  { %v1072_v48 = vpop.f32.mrb[47].mxu1  ;;  %v1701_v47 = vld [vmem:[%s4806_s5 + $0x20] sm:$0xff] }
 0x24e   :  { %v1143_v50 = vadd.f32 %v1072_v48, %v910_v3  ;;  %v1702_v48 = vld [vmem:[%s4806_s5 + $0x28] sm:$0xff] }
 0x254   :  { %v3185_v52 = vpop.f32.mrb[48].mxu1 }
 0x255   :  { %v1146_v40 = vadd.f32 %v3185_v52, %v913_v25  ;;  %v1091_v53 = vpop.f32.mrb[49].mxu1 }
 0x256   :  { %v3802_v53 = vpack.c.bf16 %v1702_v48, %v1701_v47  ;;  %v2481_v48 = vld [vmem:[%s4806_s5 + $0x100] sm:$0xff] }
 0x258   :  { %v3188_v54 = vpop.f32.mrb[50].mxu1 }
 0x259   :  { %v1100_v55 = vpop.f32.mrb[51].mxu1 }
 0x25a   :  { %v1147_v57 = vadd.f32 %v1100_v55, %v914_v20 }
 0x260   :  { %v3194_v58 = vpop.f32.mrb[52].mxu1 }
 0x261   :  { %v1150_v49 = vadd.f32 %v3194_v58, %v917_v35  ;;  %v1119_v59 = vpop.f32.mrb[53].mxu1  ;;  %v1704_v58 = vld [vmem:[%s4806_s5 + $0x38] sm:$0xff] }
 0x264   :  { %v3197_v56 = vpop.f32.mrb[54].mxu1 }
 0x265   :  { %v1128_v61 = vpop.f32.mrb[55].mxu1 }
 0x266   :  { %v1151_v62 = vadd.f32 %v1128_v61, %v918_v41  ;;  %v1718_v61 = vld [vmem:[#allocation2 + $0x29] sm:$0xff] }
 0x26c   :  { %v3235_v2 = vpop.f32.mrb[56].mxu1 }
 0x26d   :  { %v1372_v1 = vadd.f32 %v3235_v2, %v1138_v34  ;;  %v1269_v51 = vpop.f32.mrb[57].mxu1  ;;  %v1699_v34 = vld [vmem:[%s4806_s5 + $0x10] sm:$0xff] }
 0x270   :  { %v3238_v4 = vpop.f32.mrb[58].mxu1 }
 0x271   :  { %v1278_v5 = vpop.f32.mrb[59].mxu1  ;;  %v1706_v4 = vld [vmem:[%s4806_s5 + $0x48] sm:$0xff] }
 0x272   :  { %v1373_v7 = vadd.f32 %v1278_v5, %v1139_v37 }
 0x278   :  { %v3244_v8 = vpop.f32.mrb[60].mxu1 }
 0x279   :  { %v4584_v9 = vadd.f32 %v3244_v8, %v1142_v43  ;;  %v1297_v60 = vpop.f32.mrb[61].mxu1  ;;  %v3798_v43 = vpack.c.bf16 %v1700_v19, %v1699_v34 }
 0x27c   :  { %v3247_v10 = vpop.f32.mrb[62].mxu1 }
 0x27d   :  { %v1306_v21 = vpop.f32.mrb[63].mxu1  ;;  %v1721_v10 = vld [vmem:[#allocation2 + $0x41] sm:$0xff] }
 0x27e   :  { %v4586_v11 = vadd.f32 %v1306_v21, %v1143_v50 }
 0x284   :  { %v3253_v12 = vpop.f32.mrb[64].mxu1 }
 0x285   :  { %v4588_v22 = vadd.f32 %v3253_v12, %v1146_v40  ;;  %v1325_v6 = vpop.f32.mrb[65].mxu1 }
 0x286   :  { %v1707_v6 = vld [vmem:[%s4806_s5 + $0x50] sm:$0xff] }
 0x288   :  { %v3256_v3 = vpop.f32.mrb[66].mxu1 }
 0x289   :  { %v1334_v24 = vpop.f32.mrb[67].mxu1 }
 0x28a   :  { %v4590_v15 = vadd.f32 %v1334_v24, %v1147_v57  ;;  %v1703_v57 = vld [vmem:[%s4806_s5 + $0x30] sm:$0xff] }
 0x28b   :  { %v3806_v2 = vpack.c.bf16 %v1704_v58, %v1703_v57 }
 0x290   :  { %v3262_v25 = vpop.f32.mrb[68].mxu1 }
 0x291   :  { %v4592_v17 = vadd.f32 %v3262_v25, %v1150_v49  ;;  %v1353_v18 = vpop.f32.mrb[69].mxu1 }
 0x294   :  { %v3265_v26 = vpop.f32.mrb[70].mxu1 }
 0x295   :  { %v1362_v20 = vpop.f32.mrb[71].mxu1 }
 0x296   :  { %v4594_v29 = vadd.f32 %v1362_v20, %v1151_v62 }
 0x298   :  { %v3300_v13 = vpop.f32.mrb[0].mxu1 }
 0x299   :  { %v3858_v35 = vadd.f32 %v3300_v13, %v4493_v45  ;;  %v1493_v36 = vpop.f32.mrb[1].mxu1  ;;  %v1709_v13 = vld [vmem:[%s4806_s5 + $0x60] sm:$0xff] }
 0x29a   :  { %v3859_v16 = vadd.f32 %v1493_v36, %v4495_v46 }
 0x29b   :  { %v1626_v38 = vadd.f32 %v3858_v35, %v4599_v27  ;;  %v1710_v35 = vld [vmem:[%s4806_s5 + $0x68] sm:$0xff] }
 0x29c   :  { %v1625_v41 = vadd.f32 %v3859_v16, %v4599_v27  ;;  %v3303_v39 = vpop.f32.mrb[72].mxu1  ;;  %v3818_v34 = vpack.c.bf16 %v1710_v35, %v1709_v13  ;;  %v2489_v35 = vld [vmem:[%s4806_s5 + $0x140] sm:$0xff] }
 0x29d   :  { %v1642_v32 = vmax.f32 %v1626_v38, 0.0  ;;  %v1606_v33 = vadd.f32 %v3303_v39, %v1372_v1  ;;  %v1503_v37 = vpop.f32.mrb[73].mxu1 }
 0x29e   :  { %v1641_v45 = vmax.f32 %v1625_v41, 0.0  ;;  %v1724_v41 = vld [vmem:[#allocation2 + $0x59] sm:$0xff] }
 0x29f   :  { %1658 = vst [vmem:[#allocation2 + $0x9] sm:$0xff] %v1642_v32  ;;  %v1627_v46 = vadd.f32 %v4599_v27, %v1606_v33  ;;  %v1712_v33 = vld [vmem:[%s4806_s5 + $0x78] sm:$0xff] }
 0x2a0   :  { %1657 = vst [vmem:[#allocation2 + $0x1] sm:$0xff] %v1641_v45  ;;  %v3306_v44 = vpop.f32.mrb[74].mxu1  ;;  %3366 = vmatprep.mubr.f32.mxu0 %v1641_v45 }
 0x2a1   :  { %v1643_v50 = vmax.f32 %v1627_v46, 0.0  ;;  %v1512_v52 = vpop.f32.mrb[75].mxu1  ;;  %3367 = vmatmul.mubr.f32.vlgmr.msra.gmra.mrb[32].mxu0 %v1642_v32 }
 0x2a2   :  { %v1607_v40 = vadd.f32 %v1512_v52, %v1373_v7  ;;  %3797 = vmatpush3.bf16.msra.mxu0 %v4581_v28  ;;  %3369 = vmatprep.mubr.f32.mxu0 %v1715_v42 }
 0x2a3   :  { %1659 = vst [vmem:[#allocation2 + $0x19] sm:$0xff] %v1643_v50  ;;  %3799 = vmatprep.subr.bf16.mxu0 %v3798_v43 }
 0x2a4   :  { %v1628_v54 = vadd.f32 %v4599_v27, %v1607_v40  ;;  %v3309_v55 = vpop.f32.mrb[6].mxu1 }
 0x2a5   :  { %v3860_v49 = vadd.f32 %v3309_v55, %v4501_v63  ;;  %v1521_v59 = vpop.f32.mrb[7].mxu1  ;;  %3370 = vmatmul.mubr.f32.gmra.mrb[34].mxu0 %v1643_v50  ;;  %v1705_v63 = vld [vmem:[%s4806_s5 + $0x40] sm:$0xff] }
 0x2a6   :  { %v1644_v28 = vmax.f32 %v1628_v54, 0.0  ;;  %v3861_v56 = vadd.f32 %v1521_v59, %v4503_v0  ;;  %3801 = vmatpush3.bf16.msra.mxu0 %v3798_v43  ;;  %v3810_v21 = vpack.c.bf16 %v1706_v4, %v1705_v63  ;;  %v1727_v43 = vld [vmem:[#allocation2 + $0x71] sm:$0xff] }
 0x2a7   :  { %v1630_v62 = vadd.f32 %v3860_v49, %v4599_v27  ;;  %3803 = vmatprep.subr.bf16.mxu0 %v3802_v53 }
 0x2a8   :  { %1660 = vst [vmem:[#allocation2 + $0x21] sm:$0xff] %v1644_v28  ;;  %v1629_v1 = vadd.f32 %v3861_v56, %v4599_v27  ;;  %v3312_v51 = vpop.f32.mrb[76].mxu1  ;;  %3372 = vmatprep.mubr.f32.mxu0 %v1644_v28  ;;  %v1730_v28 = vld [vmem:[#allocation2 + $0x89] sm:$0xff] }
 0x2a9   :  { %v1646_v0 = vmax.f32 %v1630_v62, 0.0  ;;  %v1610_v5 = vadd.f32 %v3312_v51, %v4584_v9  ;;  %v1531_v7 = vpop.f32.mrb[77].mxu1  ;;  %3373 = vmatmul.mubr.f32.gmra.mrb[36].mxu0 %v1718_v61  ;;  %v1708_v9 = vld [vmem:[%s4806_s5 + $0x58] sm:$0xff] }
 0x2aa   :  { %v1645_v8 = vmax.f32 %v1629_v1, 0.0  ;;  %3805 = vmatpush3.bf16.msra.mxu0 %v3802_v53  ;;  %v3814_v18 = vpack.c.bf16 %v1708_v9, %v1707_v6  ;;  %v2486_v6 = vld [vmem:[%s4806_s5 + $0x128] sm:$0xff]  ;;  %v1675_v9 = vld [vmem:[#allocation2 + $0x10] sm:$0xff] }
 0x2ab   :  { %1662 = vst [vmem:[#allocation2 + $0x39] sm:$0xff] %v1646_v0  ;;  %v1631_v60 = vadd.f32 %v4599_v27, %v1610_v5  ;;  %3807 = vmatprep.subr.bf16.mxu0 %v3806_v2 }
 0x2ac   :  { %1661 = vst [vmem:[#allocation2 + $0x31] sm:$0xff] %v1645_v8  ;;  %v3315_v12 = vpop.f32.mrb[78].mxu1  ;;  %3375 = vmatprep.mubr.f32.mxu0 %v1645_v8  ;;  %v1736_v8 = vld [vmem:[#allocation2 + $0xb9] sm:$0xff] }
 0x2ad   :  { %v1647_v3 = vmax.f32 %v1631_v60, 0.0  ;;  %v1540_v24 = vpop.f32.mrb[79].mxu1  ;;  %3376 = vmatmul.mubr.f32.gmra.mrb[38].mxu0 %v1646_v0  ;;  %v2483_v60 = vld [vmem:[%s4806_s5 + $0x110] sm:$0xff]  ;;  %v1674_v12 = vld [vmem:[#allocation2 + $0x8] sm:$0xff] }
 0x2ae   :  { %v1611_v25 = vadd.f32 %v1540_v24, %v4586_v11  ;;  %3378 = vmatprep.mubr.f32.mxu0 %v1721_v10  ;;  %3809 = vmatpush3.bf16.msra.mxu0 %v3806_v2  ;;  %v2484_v10 = vld [vmem:[%s4806_s5 + $0x118] sm:$0xff] }
 0x2af   :  { %1663 = vst [vmem:[#allocation2 + $0x49] sm:$0xff] %v1647_v3  ;;  %3811 = vmatprep.subr.bf16.mxu0 %v3810_v21  ;;  %v1676_v24 = vld [vmem:[#allocation2 + $0x18] sm:$0xff]  ;;  %v1678_v13 = vld [vmem:[#allocation2 + $0x28] sm:$0xff] }
 0x2b0   :  { %v1632_v26 = vadd.f32 %v4599_v27, %v1611_v25  ;;  %v3318_v20 = vpop.f32.mrb[12].mxu1  ;;  %v2487_v25 = vld [vmem:[%s4806_s5 + $0x130] sm:$0xff] }
 0x2b1   :  { %v3862_v36 = vadd.f32 %v3318_v20, %v4509_v14  ;;  %v1549_v16 = vpop.f32.mrb[13].mxu1  ;;  %3379 = vmatmul.mubr.f32.gmra.mrb[40].mxu0 %v1647_v3  ;;  %v1711_v14 = vld [vmem:[%s4806_s5 + $0x70] sm:$0xff] }
 0x2b2   :  { %v1648_v11 = vmax.f32 %v1632_v26, 0.0  ;;  %v3863_v38 = vadd.f32 %v1549_v16, %v4511_v23  ;;  %3813 = vmatpush3.bf16.msra.mxu0 %v3810_v21  ;;  %v3822_v44 = vpack.c.bf16 %v1712_v33, %v1711_v14  ;;  %v1673_v21 = vld [vmem:[#allocation2] sm:$0xff]  ;;  %v2494_v33 = vld [vmem:[%s4806_s5 + $0x168] sm:$0xff] }
 0x2b3   :  { %v1634_v39 = vadd.f32 %v3862_v36, %v4599_v27  ;;  %3815 = vmatprep.subr.bf16.mxu0 %v3814_v18  ;;  %v1677_v26 = vld [vmem:[#allocation2 + $0x20] sm:$0xff]  ;;  %v2490_v36 = vld [vmem:[%s4806_s5 + $0x148] sm:$0xff]  ;;  %v1679_v16 = vld [vmem:[#allocation2 + $0x30] sm:$0xff] }
 0x2b4   :  { %1664 = vst [vmem:[#allocation2 + $0x51] sm:$0xff] %v1648_v11  ;;  %v1633_v19 = vadd.f32 %v3863_v38, %v4599_v27  ;;  %v3321_v32 = vpop.f32.mrb[80].mxu1  ;;  %3381 = vmatprep.mubr.f32.mxu0 %v1648_v11  ;;  %v3842_v11 = vpack.c.bf16 %v2490_v36, %v2489_v35  ;;  %v1680_v38 = vld [vmem:[#allocation2 + $0x38] sm:$0xff]  ;;  %v2493_v14 = vld [vmem:[%s4806_s5 + $0x160] sm:$0xff] }
 0x2b5   :  { %v1650_v23 = vmax.f32 %v1634_v39, 0.0  ;;  %v1614_v37 = vadd.f32 %v3321_v32, %v4588_v22  ;;  %v1559_v45 = vpop.f32.mrb[81].mxu1  ;;  %3382 = vmatmul.mubr.f32.gmra.mrb[42].mxu0 %v1724_v41  ;;  %v2482_v22 = vld [vmem:[%s4806_s5 + $0x108] sm:$0xff]  ;;  %v2491_v41 = vld [vmem:[%s4806_s5 + $0x150] sm:$0xff]  ;;  %v2492_v39 = vld [vmem:[%s4806_s5 + $0x158] sm:$0xff] }
 0x2b6   :  { %v1649_v46 = vmax.f32 %v1633_v19, 0.0  ;;  %3817 = vmatpush3.bf16.msra.mxu0 %v3814_v18  ;;  %v3826_v53 = vpack.c.bf16 %v2482_v22, %v2481_v48  ;;  %v2488_v18 = vld [vmem:[%s4806_s5 + $0x138] sm:$0xff]  ;;  %v3846_v19 = vpack.c.bf16 %v2492_v39, %v2491_v41  ;;  %v1682_v32 = vld [vmem:[#allocation2 + $0x48] sm:$0xff] }
 0x2b7   :  { %1666 = vst [vmem:[#allocation2 + $0x69] sm:$0xff] %v1650_v23  ;;  %v1635_v42 = vadd.f32 %v4599_v27, %v1614_v37  ;;  %3819 = vmatprep.subr.bf16.mxu0 %v3818_v34  ;;  %v3838_v20 = vpack.c.bf16 %v2488_v18, %v2487_v25  ;;  %v3850_v37 = vpack.c.bf16 %v2494_v33, %v2493_v14 }
 0x2b8   :  { %1665 = vst [vmem:[#allocation2 + $0x61] sm:$0xff] %v1649_v46  ;;  %v3324_v47 = vpop.f32.mrb[82].mxu1  ;;  %3384 = vmatprep.mubr.f32.mxu0 %v1649_v46  ;;  %v2495_v46 = vld [vmem:[%s4806_s5 + $0x170] sm:$0xff] }
 0x2b9   :  { %v1651_v50 = vmax.f32 %v1635_v42, 0.0  ;;  %v1568_v52 = vpop.f32.mrb[83].mxu1  ;;  %3385 = vmatmul.mubr.f32.gmra.mrb[44].mxu0 %v1650_v23  ;;  %v2496_v42 = vld [vmem:[%s4806_s5 + $0x178] sm:$0xff] }
 0x2ba   :  { %v1615_v40 = vadd.f32 %v1568_v52, %v4590_v15  ;;  %3387 = vmatprep.mubr.f32.mxu0 %v1727_v43  ;;  %3821 = vmatpush3.bf16.msra.mxu0 %v3818_v34  ;;  %v1681_v34 = vld [vmem:[#allocation2 + $0x40] sm:$0xff] }
 0x2bb   :  { %1667 = vst [vmem:[#allocation2 + $0x79] sm:$0xff] %v1651_v50  ;;  %3823 = vmatprep.subr.bf16.mxu0 %v3822_v44  ;;  %v1683_v23 = vld [vmem:[#allocation2 + $0x50] sm:$0xff]  ;;  %v1684_v45 = vld [vmem:[#allocation2 + $0x58] sm:$0xff] }
 0x2bc   :  { %v1636_v54 = vadd.f32 %v4599_v27, %v1615_v40  ;;  %v3327_v55 = vpop.f32.mrb[18].mxu1 }
 0x2bd   :  { %v3864_v57 = vadd.f32 %v3327_v55, %v4523_v30  ;;  %v1577_v58 = vpop.f32.mrb[19].mxu1  ;;  %3388 = vmatmul.mubr.f32.gmra.mrb[46].mxu0 %v1651_v50 }
 0x2be   :  { %v1652_v49 = vmax.f32 %v1636_v54, 0.0  ;;  %v3865_v59 = vadd.f32 %v1577_v58, %v4525_v31  ;;  %3825 = vmatpush3.bf16.msra.mxu0 %v3822_v44  ;;  %v1733_v31 = vld [vmem:[#allocation2 + $0xa1] sm:$0xff]  ;;  %v3854_v44 = vpack.c.bf16 %v2496_v42, %v2495_v46  ;;  %v1687_v48 = vld [vmem:[#allocation2 + $0x70] sm:$0xff] }
 0x2bf   :  { %v1638_v56 = vadd.f32 %v3864_v57, %v4599_v27  ;;  %3827 = vmatprep.subr.bf16.mxu0 %v3826_v53  ;;  %v1685_v43 = vld [vmem:[#allocation2 + $0x60] sm:$0xff]  ;;  %v1686_v47 = vld [vmem:[#allocation2 + $0x68] sm:$0xff] }
 0x2c0   :  { %1668 = vst [vmem:[#allocation2 + $0x81] sm:$0xff] %v1652_v49  ;;  %v1637_v15 = vadd.f32 %v3865_v59, %v4599_v27  ;;  %v3330_v61 = vpop.f32.mrb[84].mxu1  ;;  %3390 = vmatprep.mubr.f32.mxu0 %v1652_v49  ;;  %v2108_v49 = vld [vmem:[#allocation2 + $0x2] sm:$0xff]  ;;  %v2109_v59 = vld [vmem:[#allocation2 + $0xa] sm:$0xff] }
 0x2c1   :  { %v1654_v62 = vmax.f32 %v1638_v56, 0.0  ;;  %v1618_v2 = vadd.f32 %v3330_v61, %v4592_v17  ;;  %v1587_v1 = vpop.f32.mrb[85].mxu1  ;;  %3391 = vmatmul.mubr.f32.gmra.mrb[48].mxu0 %v1730_v28  ;;  %v2110_v28 = vld [vmem:[#allocation2 + $0x12] sm:$0xff]  ;;  %v2111_v56 = vld [vmem:[#allocation2 + $0x1a] sm:$0xff]  ;;  %v2113_v61 = vld [vmem:[#allocation2 + $0x2a] sm:$0xff] }
 0x2c2   :  { %v1653_v30 = vmax.f32 %v1637_v15, 0.0  ;;  %v1688_v22 = vld [vmem:[#allocation2 + $0x78] sm:$0xff]  ;;  %v2112_v15 = vld [vmem:[#allocation2 + $0x22] sm:$0xff] }
 0x2c3   :  { %1670 = vst [vmem:[#allocation2 + $0x99] sm:$0xff] %v1654_v62  ;;  %v1639_v51 = vadd.f32 %v4599_v27, %v1618_v2  ;;  %v2115_v2 = vld [vmem:[#allocation2 + $0x3a] sm:$0xff]  ;;  %v2116_v1 = vld [vmem:[#allocation2 + $0x42] sm:$0xff] }
 0x2c4   :  { %1669 = vst [vmem:[#allocation2 + $0x91] sm:$0xff] %v1653_v30  ;;  %v3333_v63 = vpop.f32.mrb[86].mxu1  ;;  %3393 = vmatprep.mubr.f32.mxu0 %v1653_v30  ;;  %v2117_v30 = vld [vmem:[#allocation2 + $0x4a] sm:$0xff] }
 0x2c5   :  { %v1655_v4 = vmax.f32 %v1639_v51, 0.0  ;;  %v1596_v0 = vpop.f32.mrb[87].mxu1  ;;  %3394 = vmatmul.mubr.f32.gmra.mrb[50].mxu0 %v1654_v62  ;;  %v2114_v62 = vld [vmem:[#allocation2 + $0x32] sm:$0xff]  ;;  %v2120_v63 = vld [vmem:[#allocation2 + $0x62] sm:$0xff] }
 0x2c6   :  { %v1619_v5 = vadd.f32 %v1596_v0, %v4594_v29  ;;  %3396 = vmatprep.mubr.f32.mxu0 %v1733_v31  ;;  %v3830_v29 = vpack.c.bf16 %v2484_v10, %v2483_v60  ;;  %v2118_v51 = vld [vmem:[#allocation2 + $0x52] sm:$0xff]  ;;  %v2119_v31 = vld [vmem:[#allocation2 + $0x5a] sm:$0xff] }
 0x2c7   :  { %1671 = vst [vmem:[#allocation2 + $0xa9] sm:$0xff] %v1655_v4  ;;  %v1689_v50 = vld [vmem:[#allocation2 + $0x80] sm:$0xff]  ;;  %v1690_v52 = vld [vmem:[#allocation2 + $0x88] sm:$0xff]  ;;  %v2122_v0 = vld [vmem:[#allocation2 + $0x72] sm:$0xff] }
 0x2c8   :  { %v1640_v7 = vadd.f32 %v4599_v27, %v1619_v5  ;;  %v2485_v27 = vld [vmem:[%s4806_s5 + $0x120] sm:$0xff] }
 0x2c9   :  { %3397 = vmatmul.mubr.f32.gmra.mrb[52].mxu0 %v1655_v4  ;;  %v3834_v3 = vpack.c.bf16 %v2486_v6, %v2485_v27  ;;  %v2121_v4 = vld [vmem:[#allocation2 + $0x6a] sm:$0xff]  ;;  %v2123_v5 = vld [vmem:[#allocation2 + $0x7a] sm:$0xff] }
 0x2ca   :  { %v1656_v17 = vmax.f32 %v1640_v7, 0.0  ;;  %v1693_v54 = vld [vmem:[#allocation2 + $0xa0] sm:$0xff] }
 0x2cb   :  { %v1691_v40 = vld [vmem:[#allocation2 + $0x90] sm:$0xff]  ;;  %v2124_v7 = vld [vmem:[#allocation2 + $0x82] sm:$0xff]  ;;  %v2127_v60 = vld [vmem:[#allocation2 + $0x9a] sm:$0xff] }
 0x2cc   :  { %1672 = vst [vmem:[#allocation2 + $0xb1] sm:$0xff] %v1656_v17  ;;  %3399 = vmatprep.mubr.f32.mxu0 %v1656_v17  ;;  %v2125_v17 = vld [vmem:[#allocation2 + $0x8a] sm:$0xff] }
 0x2cd   :  { %3400 = vmatmul.mubr.f32.gmra.mrb[54].mxu0 %v1736_v8  ;;  %v2126_v8 = vld [vmem:[#allocation2 + $0x92] sm:$0xff] }
 0x2ce   :  { %3434 = vmatprep.mubr.f32.mxu0 %v1673_v21  ;;  %v1694_v55 = vld [vmem:[#allocation2 + $0xa8] sm:$0xff] }
 0x2cf   :  { %v2128_v10 = vld [vmem:[#allocation2 + $0xa2] sm:$0xff] }
 0x2d1   :  { %3435 = vmatmul.mubr.f32.vlgmr.msra.gmra.mrb[32].mxu0 %v1674_v12  ;;  %v2131_v12 = vld [vmem:[#allocation2 + $0xba] sm:$0xff] }
 0x2d2   :  { %3829 = vmatpush3.bf16.msra.mxu0 %v3826_v53  ;;  %3437 = vmatprep.mubr.f32.mxu0 %v1675_v9  ;;  %v1692_v53 = vld [vmem:[#allocation2 + $0x98] sm:$0xff] }
 0x2d3   :  { %3831 = vmatprep.subr.bf16.mxu0 %v3830_v29  ;;  %v1695_v57 = vld [vmem:[#allocation2 + $0xb0] sm:$0xff]  ;;  %v1696_v58 = vld [vmem:[#allocation2 + $0xb8] sm:$0xff] }
 0x2d4   :  { %v2129_v21 = vld [vmem:[#allocation2 + $0xaa] sm:$0xff] }
 0x2d5   :  { %3438 = vmatmul.mubr.f32.gmra.mrb[56].mxu0 %v1676_v24 }
 0x2d6   :  { %3440 = vmatprep.mubr.f32.mxu0 %v1677_v26  ;;  %3833 = vmatpush3.bf16.msra.mxu0 %v3830_v29  ;;  %v2130_v29 = vld [vmem:[#allocation2 + $0xb2] sm:$0xff] }
 0x2d7   :  { %3835 = vmatprep.subr.bf16.mxu0 %v3834_v3 }
 0x2d9   :  { %3441 = vmatmul.mubr.f32.gmra.mrb[58].mxu0 %v1678_v13 }
 0x2da   :  { %3443 = vmatprep.mubr.f32.mxu0 %v1679_v16  ;;  %3837 = vmatpush3.bf16.msra.mxu0 %v3834_v3 }
 0x2db   :  { %3839 = vmatprep.subr.bf16.mxu0 %v3838_v20 }
 0x2dd   :  { %3444 = vmatmul.mubr.f32.gmra.mrb[38].mxu0 %v1680_v38 }
 0x2de   :  { %3446 = vmatprep.mubr.f32.mxu0 %v1681_v34  ;;  %3841 = vmatpush3.bf16.msra.mxu0 %v3838_v20 }
 0x2df   :  { %3843 = vmatprep.subr.bf16.mxu0 %v3842_v11 }
 0x2e1   :  { %3447 = vmatmul.mubr.f32.gmra.mrb[60].mxu0 %v1682_v32 }
 0x2e2   :  { %3449 = vmatprep.mubr.f32.mxu0 %v1683_v23  ;;  %3845 = vmatpush3.bf16.msra.mxu0 %v3842_v11 }
 0x2e3   :  { %3847 = vmatprep.subr.bf16.mxu0 %v3846_v19 }
 0x2e5   :  { %3450 = vmatmul.mubr.f32.gmra.mrb[62].mxu0 %v1684_v45 }
 0x2e6   :  { %3452 = vmatprep.mubr.f32.mxu0 %v1685_v43  ;;  %3849 = vmatpush3.bf16.msra.mxu0 %v3846_v19 }
 0x2e7   :  { %3851 = vmatprep.subr.bf16.mxu0 %v3850_v37 }
 0x2e9   :  { %3453 = vmatmul.mubr.f32.gmra.mrb[44].mxu0 %v1686_v47 }
 0x2ea   :  { %3455 = vmatprep.mubr.f32.mxu0 %v1687_v48  ;;  %3853 = vmatpush3.bf16.msra.mxu0 %v3850_v37 }
 0x2eb   :  { %3855 = vmatprep.subr.bf16.mxu0 %v3854_v44 }
 0x2ed   :  { %3456 = vmatmul.mubr.f32.gmra.mrb[64].mxu0 %v1688_v22 }
 0x2ee   :  { %3458 = vmatprep.mubr.f32.mxu0 %v1689_v50  ;;  %3857 = vmatpush3.bf16.msra.mxu0 %v3854_v44 }
 0x2f1   :  { %3459 = vmatmul.mubr.f32.gmra.mrb[66].mxu0 %v1690_v52 }
 0x2f2   :  { %3461 = vmatprep.mubr.f32.mxu0 %v1691_v40 }
 0x2f5   :  { %3462 = vmatmul.mubr.f32.gmra.mrb[50].mxu0 %v1692_v53 }
 0x2f6   :  { %3464 = vmatprep.mubr.f32.mxu0 %v1693_v54 }
 0x2f9   :  { %3465 = vmatmul.mubr.f32.gmra.mrb[68].mxu0 %v1694_v55 }
 0x2fa   :  { %3467 = vmatprep.mubr.f32.mxu0 %v1695_v57 }
 0x2fd   :  { %3468 = vmatmul.mubr.f32.gmra.mrb[70].mxu0 %v1696_v58  ;;  %v4729_v58 = vld [vmem:[%s4804_s6 + $0x2] ss:$0 sm:$0xff] }
 0x2fe   :  { %3502 = vmatprep.mubr.f32.mxu0 %v2108_v49 }
 0x301   :  { %3503 = vmatmul.mubr.f32.vlgmr.msra.gmra.mrb[32].mxu0 %v2109_v59 }
 0x302   :  { %3505 = vmatprep.mubr.f32.mxu0 %v2110_v28 }
 0x305   :  { %3506 = vmatmul.mubr.f32.gmra.mrb[72].mxu0 %v2111_v56 }
 0x306   :  { %3508 = vmatprep.mubr.f32.mxu0 %v2112_v15 }
 0x309   :  { %3509 = vmatmul.mubr.f32.gmra.mrb[74].mxu0 %v2113_v61 }
 0x30a   :  { %3511 = vmatprep.mubr.f32.mxu0 %v2114_v62 }
 0x30d   :  { %3512 = vmatmul.mubr.f32.gmra.mrb[38].mxu0 %v2115_v2 }
 0x30e   :  { %3514 = vmatprep.mubr.f32.mxu0 %v2116_v1 }
 0x311   :  { %3515 = vmatmul.mubr.f32.gmra.mrb[76].mxu0 %v2117_v30 }
 0x312   :  { %3517 = vmatprep.mubr.f32.mxu0 %v2118_v51 }
 0x315   :  { %3518 = vmatmul.mubr.f32.gmra.mrb[78].mxu0 %v2119_v31 }
 0x316   :  { %3520 = vmatprep.mubr.f32.mxu0 %v2120_v63 }
 0x319   :  { %3521 = vmatmul.mubr.f32.gmra.mrb[44].mxu0 %v2121_v4 }
 0x31a   :  { %3523 = vmatprep.mubr.f32.mxu0 %v2122_v0 }
 0x31d   :  { %3524 = vmatmul.mubr.f32.gmra.mrb[80].mxu0 %v2123_v5 }
 0x31e   :  { %3526 = vmatprep.mubr.f32.mxu0 %v2124_v7 }
 0x321   :  { %3527 = vmatmul.mubr.f32.gmra.mrb[82].mxu0 %v2125_v17 }
 0x322   :  { %3529 = vmatprep.mubr.f32.mxu0 %v2126_v8 }
 0x325   :  { %3530 = vmatmul.mubr.f32.gmra.mrb[50].mxu0 %v2127_v60 }
 0x326   :  { %3532 = vmatprep.mubr.f32.mxu0 %v2128_v10 }
 0x329   :  { %3533 = vmatmul.mubr.f32.gmra.mrb[84].mxu0 %v2129_v21 }
 0x32a   :  { %3535 = vmatprep.mubr.f32.mxu0 %v2130_v29 }
 0x32d   :  { %3536 = vmatmul.mubr.f32.gmra.mrb[86].mxu0 %v2131_v12 }
 0x378   :  { %v3371_v27 = vpop.f32.mrb[34].mxu0 }
 0x379   :  { %v1830_v6 = vpop.f32.mrb[35].mxu0 }
 0x37c   :  { %v3374_v9 = vpop.f32.mrb[36].mxu0 }
 0x37d   :  { %v1839_v3 = vpop.f32.mrb[37].mxu0 }
 0x384   :  { %v3380_v24 = vpop.f32.mrb[40].mxu0 }
 0x385   :  { %v1858_v25 = vpop.f32.mrb[41].mxu0 }
 0x388   :  { %v3383_v18 = vpop.f32.mrb[42].mxu0 }
 0x389   :  { %v1867_v26 = vpop.f32.mrb[43].mxu0 }
 0x390   :  { %v3389_v20 = vpop.f32.mrb[46].mxu0 }
 0x391   :  { %v1886_v13 = vpop.f32.mrb[47].mxu0 }
 0x394   :  { %v3392_v35 = vpop.f32.mrb[48].mxu0 }
 0x395   :  { %v1895_v36 = vpop.f32.mrb[49].mxu0 }
 0x39c   :  { %v3398_v16 = vpop.f32.mrb[52].mxu0 }
 0x39d   :  { %v1914_v11 = vpop.f32.mrb[53].mxu0 }
 0x3a0   :  { %v3401_v38 = vpop.f32.mrb[54].mxu0 }
 0x3a1   :  { %v1923_v41 = vpop.f32.mrb[55].mxu0 }
 0x3a8   :  { %v3439_v39 = vpop.f32.mrb[56].mxu0 }
 0x3a9   :  { %v2012_v34 = vadd.f32 %v3439_v39, %v3371_v27  ;;  %v2007_v19 = vpop.f32.mrb[57].mxu0 }
 0x3ac   :  { %v3442_v32 = vpop.f32.mrb[58].mxu0 }
 0x3ad   :  { %v2016_v14 = vpop.f32.mrb[59].mxu0 }
 0x3ae   :  { %v2017_v33 = vadd.f32 %v2016_v14, %v1839_v3 }
 0x3b4   :  { %v3448_v23 = vpop.f32.mrb[60].mxu0 }
 0x3b5   :  { %v2040_v37 = vadd.f32 %v3448_v23, %v3380_v24  ;;  %v2035_v45 = vpop.f32.mrb[61].mxu0 }
 0x3b8   :  { %v3451_v46 = vpop.f32.mrb[62].mxu0 }
 0x3b9   :  { %v2044_v42 = vpop.f32.mrb[63].mxu0 }
 0x3ba   :  { %v2045_v43 = vadd.f32 %v2044_v42, %v1867_v26 }
 0x3c0   :  { %v3457_v44 = vpop.f32.mrb[64].mxu0 }
 0x3c1   :  { %v2068_v47 = vadd.f32 %v3457_v44, %v3389_v20  ;;  %v2063_v48 = vpop.f32.mrb[65].mxu0 }
 0x3c4   :  { %v3460_v22 = vpop.f32.mrb[66].mxu0 }
 0x3c5   :  { %v2072_v50 = vpop.f32.mrb[67].mxu0 }
 0x3c6   :  { %v4722_v52 = vadd.f32 %v2072_v50, %v1895_v36 }
 0x3cc   :  { %v3466_v40 = vpop.f32.mrb[68].mxu0 }
 0x3cd   :  { %v4724_v53 = vadd.f32 %v3466_v40, %v3398_v16  ;;  %v2091_v54 = vpop.f32.mrb[69].mxu0 }
 0x3d0   :  { %v3469_v55 = vpop.f32.mrb[70].mxu0 }
 0x3d1   :  { %v2100_v57 = vpop.f32.mrb[71].mxu0 }
 0x3d2   :  { %v4731_v49 = vadd.f32 %v2100_v57, %v1923_v41 }
 0x3d4   :  { %v3504_v59 = vpop.f32.mrb[32].mxu0 }
 0x3d5   :  { %v2348_v28 = vadd.f32 %v3504_v59, %v4729_v58  ;;  %v2215_v56 = vpop.f32.mrb[33].mxu0 }
 0x3d6   :  { %v2347_v15 = vadd.f32 %v4729_v58, %v2215_v56 }
 0x3d7   :  { %v2364_v61 = vmax.f32 %v2348_v28, 0.0 }
 0x3d8   :  { %v2363_v62 = vmax.f32 %v2347_v15, 0.0  ;;  %v3507_v2 = vpop.f32.mrb[72].mxu0 }
 0x3d9   :  { %2380 = vst [vmem:[%s4807_s7 + $0x8] sm:$0xff] %v2364_v61  ;;  %v2328_v1 = vadd.f32 %v3507_v2, %v2012_v34  ;;  %v2225_v30 = vpop.f32.mrb[73].mxu0 }
 0x3da   :  { %2379 = vst [vmem:[%s4807_s7] sm:$0xff] %v2363_v62 }
 0x3db   :  { %v2349_v51 = vadd.f32 %v4729_v58, %v2328_v1 }
 0x3dc   :  { %v3510_v31 = vpop.f32.mrb[74].mxu0 }
 0x3dd   :  { %v2365_v63 = vmax.f32 %v2349_v51, 0.0  ;;  %v2234_v4 = vpop.f32.mrb[75].mxu0 }
 0x3de   :  { %v2329_v0 = vadd.f32 %v2234_v4, %v2017_v33 }
 0x3df   :  { %2381 = vst [vmem:[%s4807_s7 + $0x10] sm:$0xff] %v2365_v63 }
 0x3e0   :  { %v2350_v5 = vadd.f32 %v4729_v58, %v2329_v0  ;;  %v3513_v7 = vpop.f32.mrb[38].mxu0 }
 0x3e1   :  { %v2352_v17 = vadd.f32 %v3513_v7, %v4729_v58  ;;  %v2243_v8 = vpop.f32.mrb[39].mxu0 }
 0x3e2   :  { %v2366_v60 = vmax.f32 %v2350_v5, 0.0  ;;  %v2351_v10 = vadd.f32 %v4729_v58, %v2243_v8 }
 0x3e3   :  { %v2368_v21 = vmax.f32 %v2352_v17, 0.0 }
 0x3e4   :  { %2382 = vst [vmem:[%s4807_s7 + $0x18] sm:$0xff] %v2366_v60  ;;  %v2367_v29 = vmax.f32 %v2351_v10, 0.0  ;;  %v3516_v12 = vpop.f32.mrb[76].mxu0 }
 0x3e5   :  { %2384 = vst [vmem:[%s4807_s7 + $0x28] sm:$0xff] %v2368_v21  ;;  %v2332_v27 = vadd.f32 %v3516_v12, %v2040_v37  ;;  %v2253_v6 = vpop.f32.mrb[77].mxu0 }
 0x3e6   :  { %2383 = vst [vmem:[%s4807_s7 + $0x20] sm:$0xff] %v2367_v29 }
 0x3e7   :  { %v2353_v9 = vadd.f32 %v4729_v58, %v2332_v27 }
 0x3e8   :  { %v3519_v3 = vpop.f32.mrb[78].mxu0 }
 0x3e9   :  { %v2369_v24 = vmax.f32 %v2353_v9, 0.0  ;;  %v2262_v25 = vpop.f32.mrb[79].mxu0 }
 0x3ea   :  { %v2333_v18 = vadd.f32 %v2262_v25, %v2045_v43 }
 0x3eb   :  { %2385 = vst [vmem:[%s4807_s7 + $0x30] sm:$0xff] %v2369_v24 }
 0x3ec   :  { %v2354_v26 = vadd.f32 %v4729_v58, %v2333_v18  ;;  %v3522_v20 = vpop.f32.mrb[44].mxu0 }
 0x3ed   :  { %v2356_v13 = vadd.f32 %v3522_v20, %v4729_v58  ;;  %v2271_v35 = vpop.f32.mrb[45].mxu0 }
 0x3ee   :  { %v2370_v36 = vmax.f32 %v2354_v26, 0.0  ;;  %v2355_v16 = vadd.f32 %v4729_v58, %v2271_v35 }
 0x3ef   :  { %v2372_v11 = vmax.f32 %v2356_v13, 0.0 }
 0x3f0   :  { %2386 = vst [vmem:[%s4807_s7 + $0x38] sm:$0xff] %v2370_v36  ;;  %v2371_v38 = vmax.f32 %v2355_v16, 0.0  ;;  %v3525_v41 = vpop.f32.mrb[80].mxu0 }
 0x3f1   :  { %2388 = vst [vmem:[%s4807_s7 + $0x48] sm:$0xff] %v2372_v11  ;;  %v2336_v39 = vadd.f32 %v3525_v41, %v2068_v47  ;;  %v2281_v34 = vpop.f32.mrb[81].mxu0 }
 0x3f2   :  { %2387 = vst [vmem:[%s4807_s7 + $0x40] sm:$0xff] %v2371_v38 }
 0x3f3   :  { %v2357_v19 = vadd.f32 %v4729_v58, %v2336_v39 }
 0x3f4   :  { %v3528_v32 = vpop.f32.mrb[82].mxu0 }
 0x3f5   :  { %v2373_v14 = vmax.f32 %v2357_v19, 0.0  ;;  %v2290_v33 = vpop.f32.mrb[83].mxu0 }
 0x3f6   :  { %v2337_v23 = vadd.f32 %v2290_v33, %v4722_v52 }
 0x3f7   :  { %2389 = vst [vmem:[%s4807_s7 + $0x50] sm:$0xff] %v2373_v14 }
 0x3f8   :  { %v2358_v37 = vadd.f32 %v4729_v58, %v2337_v23  ;;  %v3531_v45 = vpop.f32.mrb[50].mxu0 }
 0x3f9   :  { %v2360_v46 = vadd.f32 %v3531_v45, %v4729_v58  ;;  %v2299_v42 = vpop.f32.mrb[51].mxu0 }
 0x3fa   :  { %v2374_v43 = vmax.f32 %v2358_v37, 0.0  ;;  %v2359_v44 = vadd.f32 %v4729_v58, %v2299_v42 }
 0x3fb   :  { %v2376_v47 = vmax.f32 %v2360_v46, 0.0 }
 0x3fc   :  { %2390 = vst [vmem:[%s4807_s7 + $0x58] sm:$0xff] %v2374_v43  ;;  %v2375_v48 = vmax.f32 %v2359_v44, 0.0  ;;  %v3534_v22 = vpop.f32.mrb[84].mxu0 }
 0x3fd   :  { %2392 = vst [vmem:[%s4807_s7 + $0x68] sm:$0xff] %v2376_v47  ;;  %v2340_v50 = vadd.f32 %v3534_v22, %v4724_v53  ;;  %v2309_v52 = vpop.f32.mrb[85].mxu0 }
 0x3fe   :  { %2391 = vst [vmem:[%s4807_s7 + $0x60] sm:$0xff] %v2375_v48 }
 0x3ff   :  { %v2361_v40 = vadd.f32 %v4729_v58, %v2340_v50 }
 0x400   :  { %v3537_v54 = vpop.f32.mrb[86].mxu0 }
 0x401   :  { %v2377_v55 = vmax.f32 %v2361_v40, 0.0  ;;  %v2318_v57 = vpop.f32.mrb[87].mxu0 }
 0x402   :  { %v2341_v59 = vadd.f32 %v2318_v57, %v4731_v49 }
 0x403   :  { %2393 = vst [vmem:[%s4807_s7 + $0x70] sm:$0xff] %v2377_v55 }
 0x404   :  { %v2362_v28 = vadd.f32 %v4729_v58, %v2341_v59 }
 0x406   :  { %v2378_v56 = vmax.f32 %v2362_v28, 0.0 }
 0x408   :  { %2394 = vst [vmem:[%s4807_s7 + $0x78] sm:$0xff] %v2378_v56 }

</bundles_post_ra>
